<compile_context>
chip_gen: v7x
topology: tpu7x:2x2x1
jax: 0.10.0
libtpu: 0.0.40
codegen_flags: <defaults>
</compile_context>

<pallas_src>
import jax
import jax.numpy as jnp
from jax.experimental import pallas as pl
from jax.experimental.pallas import tpu as pltpu

# ---- module constants (consistent with the torch forward) ----
NUM_VECTORS = 16
NUM_PIECES = 2
NUM_FEATURES = 8                    # divisible by NUM_PIECES
CHANNEL_ROT = 4
VECTOR_DIM = 256                    # nn.Linear(512, 16) expects cat of two 256-dim
NPF = NUM_FEATURES // NUM_PIECES
H1, H2 = 16, 32                     # MLP hidden sizes
LEAKY_SLOPE = 0.01                  # torch.nn.LeakyReLU default

BATCH = 256                         # example batch (any multiple of TB works)
TB = 128                            # batch rows per grid step (= lane width)

# packed small-parameter buffer layout (row starts 8-aligned, lane offset 0)
PACK_LANES = 128
W2T_ROW = 0                         # [ 0:32, 0:16]  w2^T            (32, 16)
B1_ROW = 32                         # [32:48, 0:1 ]  b1 as a column  (16, 1)
B2_ROW = 48                         # [48:80, 0:1 ]  b2 as a column  (32, 1)
W3T_ROW = 80                        # [80   , 0:32]  w3^T as a row   (1, 32)
B3_ROW = 88                         # [88   , 0   ]  b3              (1, 1)
PACK_ROWS = 96


def nano_nnue_kernel(tau_ref, logits_ref, g_ref, sharedT_ref, w1t_ref, ps_ref,
                     out_ref):
    """One batch block (TB rows): fused gumbel-softmax embeddings + 3-layer MLP.

    Everything is kept transposed so the batch dimension stays on the 128
    lanes end-to-end; the output is written as a lane-dense (1, TB) row.
    """
    inv_tau = 1.0 / tau_ref[0, 0]

    # gumbel-softmax for BOTH sides in one pass: (2, NF, NV, TB), NV on sublanes
    z = (logits_ref[...][None] + g_ref[...]) * inv_tau
    z = z - jnp.max(z, axis=2, keepdims=True)
    e = jnp.exp(z)
    probs = e * pl.reciprocal(jnp.sum(e, axis=2, keepdims=True), approx=True)

    # per-piece feature sums -> (NP*NV, TB) per side; lane-concat the two sides
    # (TB is a full vreg width, so this concat / the later slices are free).
    def piece_sums(p_side):                              # (NF, NV, TB)
        return jnp.concatenate(
            [jnp.sum(p_side[i * NPF:(i + 1) * NPF], axis=0)
             for i in range(NUM_PIECES)], axis=0)        # (NP*NV, TB)

    pp = jnp.concatenate([piece_sums(probs[0]), piece_sums(probs[1])], axis=1)

    # single MXU pass for both embeddings (transposed): (D, 2*TB)
    embT = jnp.dot(sharedT_ref[...], pp, preferred_element_type=jnp.float32)
    usT, themT = embT[:, :TB], embT[:, TB:]

    # MLP (transposed); split-w1 replaces torch.cat(us, them)
    w1T = w1t_ref[...]                                   # (H1, 2*D)
    h = (jnp.dot(w1T[:, :VECTOR_DIM], usT, preferred_element_type=jnp.float32)
         + jnp.dot(w1T[:, VECTOR_DIM:], themT, preferred_element_type=jnp.float32)
         + ps_ref[B1_ROW:B1_ROW + H1, 0:1])              # (H1, TB)
    h = jnp.maximum(h, LEAKY_SLOPE * h)

    h = (jnp.dot(ps_ref[W2T_ROW:W2T_ROW + H2, :H1], h,
                 preferred_element_type=jnp.float32)
         + ps_ref[B2_ROW:B2_ROW + H2, 0:1])              # (H2, TB)
    h = jnp.maximum(h, LEAKY_SLOPE * h)

    y = (jnp.dot(ps_ref[W3T_ROW:W3T_ROW + 1, :H2], h,
                 preferred_element_type=jnp.float32)
         + ps_ref[B3_ROW:B3_ROW + 1, 0:1])               # (1, TB) lane-dense
    out_ref[0] = y


def pack_weights(shared, w1, b1, w2, b2, w3, b3):
    """One-time host-side packing: transpose weights, pack the tiny params."""
    sharedT = jnp.transpose(shared, (2, 0, 1)).reshape(
        VECTOR_DIM, NUM_PIECES * NUM_VECTORS)            # (D, NP*NV)
    w1T = w1.T                                           # (H1, 2*D)
    ps = jnp.zeros((PACK_ROWS, PACK_LANES), jnp.float32)
    ps = ps.at[W2T_ROW:W2T_ROW + H2, :H1].set(w2.T)
    ps = ps.at[B1_ROW:B1_ROW + H1, 0].set(b1.reshape(H1))
    ps = ps.at[B2_ROW:B2_ROW + H2, 0].set(b2.reshape(H2))
    ps = ps.at[W3T_ROW, :H2].set(w3.reshape(H2))
    ps = ps.at[B3_ROW, 0].set(b3.reshape(()))
    return sharedT, w1T, ps


@jax.jit
def nano_nnue_forward(tau, logits, g_all, sharedT, w1T, packed):
    """g_all: (2, B, NUM_FEATURES, NUM_VECTORS) gumbel noise for (us, them)."""
    B = g_all.shape[1]
    if B % TB != 0:
        raise ValueError(f"batch {B} must be a multiple of {TB}")
    nblk = B // TB

    # layout plumbing only: batch -> lanes, NUM_VECTORS -> sublanes
    g_t = jnp.transpose(g_all, (0, 2, 3, 1))             # (2, NF, NV, B)
    logits_col = logits[:, :, None]                      # (NF, NV, 1)

    out = pl.pallas_call(
        nano_nnue_kernel,
        out_shape=jax.ShapeDtypeStruct((nblk, 1, TB), jnp.float32),
        grid=(nblk,),
        in_specs=[
            pl.BlockSpec(memory_space=pltpu.MemorySpace.SMEM),        # tau
            pl.BlockSpec((NUM_FEATURES, NUM_VECTORS, 1),
                         lambda i: (0, 0, 0)),                        # logits
            pl.BlockSpec((2, NUM_FEATURES, NUM_VECTORS, TB),
                         lambda i: (0, 0, 0, i)),                     # gumbels
            pl.BlockSpec((VECTOR_DIM, NUM_PIECES * NUM_VECTORS),
                         lambda i: (0, 0)),                           # shared^T
            pl.BlockSpec((H1, 2 * VECTOR_DIM), lambda i: (0, 0)),     # w1^T
            pl.BlockSpec((PACK_ROWS, PACK_LANES), lambda i: (0, 0)),  # packed
        ],
        out_specs=pl.BlockSpec((1, 1, TB), lambda i: (i, 0, 0)),
        compiler_params=pltpu.CompilerParams(
            dimension_semantics=("parallel",)),
    )(tau, logits_col, g_t, sharedT, w1T, packed)
    return out.reshape(B, 1)


def reference_forward(tau, logits, g_all, shared, w1, b1, w2, b2, w3, b3):
    """Pure-JAX reference mirroring the PyTorch forward."""
    def embed(g):                                        # (B, NF, NV)
        probs = jax.nn.softmax((logits[None] + g) / tau[0, 0], axis=-1)
        emb = jnp.zeros((g.shape[0], VECTOR_DIM), jnp.float32)
        for p in range(NUM_PIECES):
            pp = probs[:, p * NPF:(p + 1) * NPF, :]
            emb = emb + jnp.einsum('bqv,vd->bd', pp, shared[p])
        return emb
    x = jnp.concatenate([embed(g_all[0]), embed(g_all[1])], axis=1)
    h = x @ w1 + b1
    h = jnp.where(h > 0, h, LEAKY_SLOPE * h)
    h = h @ w2 + b2
    h = jnp.where(h > 0, h, LEAKY_SLOPE * h)
    return h @ w3 + b3


if __name__ == "__main__":
    key = jax.random.PRNGKey(0)
    (k_sv, k_logits, k_w1, k_b1, k_w2, k_b2, k_w3, k_b3, k_feat, k_g) = (
        jax.random.split(key, 10))

    # ---- parameters (mirror Embedding / nn.Sequential shapes) ----
    shared_gen = jax.random.normal(k_sv, (NUM_VECTORS, VECTOR_DIM), jnp.float32)
    shared = jnp.stack(
        [jnp.roll(shared_gen, shift=p * CHANNEL_ROT, axis=1)
         for p in range(NUM_PIECES)], axis=0)            # (NP, NV, D)
    logits = jax.random.uniform(k_logits, (NUM_FEATURES, NUM_VECTORS),
                                jnp.float32)             # torch.rand

    # Linear(512,16) -> LeakyReLU -> Linear(16,32) -> LeakyReLU -> Linear(32,1)
    w1 = 0.05 * jax.random.normal(k_w1, (2 * VECTOR_DIM, H1), jnp.float32)
    b1 = 0.05 * jax.random.normal(k_b1, (1, H1), jnp.float32)
    w2 = 0.05 * jax.random.normal(k_w2, (H1, H2), jnp.float32)
    b2 = 0.05 * jax.random.normal(k_b2, (1, H2), jnp.float32)
    w3 = 0.05 * jax.random.normal(k_w3, (H2, 1), jnp.float32)
    b3 = 0.05 * jax.random.normal(k_b3, (1, 1), jnp.float32)

    # features values are unused by the torch forward (only the batch size is);
    # constructed for interface parity, and the batch size is taken from it.
    features = jax.random.normal(k_feat, (BATCH, 2, NUM_FEATURES), jnp.float32)
    B = features.shape[0]

    # gumbel noise for the two Embedding calls (F.gumbel_softmax internals),
    # pre-stacked as (side, batch, feature, vector).
    u = jax.random.uniform(k_g, (2, B, NUM_FEATURES, NUM_VECTORS),
                           jnp.float32, minval=1e-6, maxval=1.0)
    g_all = -jnp.log(-jnp.log(u))

    tau = jnp.array([[1.0]], dtype=jnp.float32)          # schedule_train_params(0)

    sharedT, w1T, packed = pack_weights(shared, w1, b1, w2, b2, w3, b3)

    out = nano_nnue_forward(tau, logits, g_all, sharedT, w1T, packed)
    jax.block_until_ready(out)
    assert out.shape == (B, 1)

    ref = reference_forward(tau, logits, g_all, shared, w1, b1, w2, b2, w3, b3)
    err = float(jnp.max(jnp.abs(out - ref)))
    # 1e-3: the only non-exact step vs. the pure-JAX reference is the
    # approx-reciprocal softmax normalization; the rest is f32 MXU/VPU math.
    assert jnp.allclose(out, ref, atol=1e-3, rtol=1e-3), (err, out[:4], ref[:4])

    print("KERNEL_OK")
</pallas_src>

<mosaic_0001>
module attributes {stable_mosaic.version = 11 : i64} {
  func.func @nano_nnue_kernel(%arg0: i32, %arg1: memref<1x1xf32, #tpu.memory_space<smem>>, %arg2: memref<8x16x1xf32, #tpu.memory_space<vmem>>, %arg3: memref<2x8x16x128xf32, #tpu.memory_space<vmem>>, %arg4: memref<256x32xf32, #tpu.memory_space<vmem>>, %arg5: memref<16x512xf32, #tpu.memory_space<vmem>>, %arg6: memref<96x128xf32, #tpu.memory_space<vmem>>, %arg7: memref<1x1x128xf32, #tpu.memory_space<vmem>>) attributes {dimension_semantics = [#tpu.dimension_semantics<parallel>], iteration_bounds = array<i64: 2>, scalar_prefetch = 0 : i64, scratch_operands = 0 : i64, tpu.core_type = #tpu.core_type<tc>, window_params = [{transform_indices = @transform_0, window_bounds = array<i64: 1, 1>}, {pipeline_mode = #tpu.pipeline_mode<synchronous>, transform_indices = @transform_1, window_bounds = array<i64: 8, 16, 1>}, {transform_indices = @transform_2, window_bounds = array<i64: 2, 8, 16, 128>}, {pipeline_mode = #tpu.pipeline_mode<synchronous>, transform_indices = @transform_3, window_bounds = array<i64: 256, 32>}, {pipeline_mode = #tpu.pipeline_mode<synchronous>, transform_indices = @transform_4, window_bounds = array<i64: 16, 512>}, {pipeline_mode = #tpu.pipeline_mode<synchronous>, transform_indices = @transform_5, window_bounds = array<i64: 96, 128>}, {transform_indices = @transform_6, window_bounds = array<i64: 1, 1, 128>}]} {
    %c0 = arith.constant 0 : index
    %c0_0 = arith.constant 0 : index
    %0 = memref.load %arg1[%c0, %c0_0] : memref<1x1xf32, #tpu.memory_space<smem>>
    %cst = arith.constant 1.000000e+00 : f32
    %1 = arith.divf %cst, %0 : f32
    %c0_1 = arith.constant 0 : index
    %c0_2 = arith.constant 0 : index
    %c0_3 = arith.constant 0 : index
    %2 = vector.load %arg2[%c0_1, %c0_2, %c0_3] : memref<8x16x1xf32, #tpu.memory_space<vmem>>, vector<8x16x1xf32>
    %3 = vector.shape_cast %2 : vector<8x16x1xf32> to vector<1x8x16x1xf32>
    %c0_4 = arith.constant 0 : index
    %c0_5 = arith.constant 0 : index
    %c0_6 = arith.constant 0 : index
    %c0_7 = arith.constant 0 : index
    %4 = vector.load %arg3[%c0_4, %c0_5, %c0_6, %c0_7] : memref<2x8x16x128xf32, #tpu.memory_space<vmem>>, vector<2x8x16x128xf32>
    %5 = vector.broadcast %3 : vector<1x8x16x1xf32> to vector<2x8x16x128xf32>
    %6 = arith.addf %5, %4 : vector<2x8x16x128xf32>
    %7 = vector.broadcast %1 : f32 to vector<2x8x16x128xf32>
    %8 = arith.mulf %6, %7 : vector<2x8x16x128xf32>
    %cst_8 = arith.constant dense<0xFF800000> : vector<2x8x128xf32>
    %9 = vector.multi_reduction <maximumf>, %8, %cst_8 [2] : vector<2x8x16x128xf32> to vector<2x8x128xf32>
    %10 = vector.shape_cast %9 : vector<2x8x128xf32> to vector<2x8x1x128xf32>
    %11 = vector.broadcast %10 : vector<2x8x1x128xf32> to vector<2x8x16x128xf32>
    %12 = arith.subf %8, %11 : vector<2x8x16x128xf32>
    %13 = math.exp %12 : vector<2x8x16x128xf32>
    %cst_9 = arith.constant dense<0.000000e+00> : vector<2x8x128xf32>
    %14 = vector.multi_reduction <add>, %13, %cst_9 [2] : vector<2x8x16x128xf32> to vector<2x8x128xf32>
    %15 = vector.shape_cast %14 : vector<2x8x128xf32> to vector<2x8x1x128xf32>
    %16 = tpu.reciprocal %15 {approx = true} : vector<2x8x1x128xf32> -> vector<2x8x1x128xf32>
    %17 = vector.broadcast %16 : vector<2x8x1x128xf32> to vector<2x8x16x128xf32>
    %18 = arith.mulf %13, %17 : vector<2x8x16x128xf32>
    %19 = vector.extract_strided_slice %18 {offsets = [0, 0, 0, 0], sizes = [1, 8, 16, 128], strides = [1, 1, 1, 1]} : vector<2x8x16x128xf32> to vector<1x8x16x128xf32>
    %20 = vector.shape_cast %19 : vector<1x8x16x128xf32> to vector<8x16x128xf32>
    %21 = vector.extract_strided_slice %20 {offsets = [0, 0, 0], sizes = [4, 16, 128], strides = [1, 1, 1]} : vector<8x16x128xf32> to vector<4x16x128xf32>
    %cst_10 = arith.constant dense<0.000000e+00> : vector<16x128xf32>
    %22 = vector.multi_reduction <add>, %21, %cst_10 [0] : vector<4x16x128xf32> to vector<16x128xf32>
    %23 = vector.extract_strided_slice %20 {offsets = [4, 0, 0], sizes = [4, 16, 128], strides = [1, 1, 1]} : vector<8x16x128xf32> to vector<4x16x128xf32>
    %cst_11 = arith.constant dense<0.000000e+00> : vector<16x128xf32>
    %24 = vector.multi_reduction <add>, %23, %cst_11 [0] : vector<4x16x128xf32> to vector<16x128xf32>
    %25 = tpu.concatenate %22, %24 in 0 : vector<16x128xf32>, vector<16x128xf32> -> vector<32x128xf32>
    %26 = vector.extract_strided_slice %18 {offsets = [1, 0, 0, 0], sizes = [1, 8, 16, 128], strides = [1, 1, 1, 1]} : vector<2x8x16x128xf32> to vector<1x8x16x128xf32>
    %27 = vector.shape_cast %26 : vector<1x8x16x128xf32> to vector<8x16x128xf32>
    %28 = vector.extract_strided_slice %27 {offsets = [0, 0, 0], sizes = [4, 16, 128], strides = [1, 1, 1]} : vector<8x16x128xf32> to vector<4x16x128xf32>
    %cst_12 = arith.constant dense<0.000000e+00> : vector<16x128xf32>
    %29 = vector.multi_reduction <add>, %28, %cst_12 [0] : vector<4x16x128xf32> to vector<16x128xf32>
    %30 = vector.extract_strided_slice %27 {offsets = [4, 0, 0], sizes = [4, 16, 128], strides = [1, 1, 1]} : vector<8x16x128xf32> to vector<4x16x128xf32>
    %cst_13 = arith.constant dense<0.000000e+00> : vector<16x128xf32>
    %31 = vector.multi_reduction <add>, %30, %cst_13 [0] : vector<4x16x128xf32> to vector<16x128xf32>
    %32 = tpu.concatenate %29, %31 in 0 : vector<16x128xf32>, vector<16x128xf32> -> vector<32x128xf32>
    %33 = tpu.concatenate %25, %32 in 1 : vector<32x128xf32>, vector<32x128xf32> -> vector<32x256xf32>
    %c0_14 = arith.constant 0 : index
    %c0_15 = arith.constant 0 : index
    %34 = vector.load %arg4[%c0_14, %c0_15] : memref<256x32xf32, #tpu.memory_space<vmem>>, vector<256x32xf32>
    %cst_16 = arith.constant dense<0.000000e+00> : vector<256x256xf32>
    %35 = tpu.matmul %34, %33, %cst_16 {dimension_numbers = #tpu.dot_dimension_numbers<[1], [0], [0], [1], [0, 0, 1, 1], [], []>} : vector<256x32xf32>, vector<32x256xf32>, vector<256x256xf32> -> vector<256x256xf32>
    %36 = vector.extract_strided_slice %35 {offsets = [0, 0], sizes = [256, 128], strides = [1, 1]} : vector<256x256xf32> to vector<256x128xf32>
    %37 = vector.extract_strided_slice %35 {offsets = [0, 128], sizes = [256, 128], strides = [1, 1]} : vector<256x256xf32> to vector<256x128xf32>
    %c0_17 = arith.constant 0 : index
    %c0_18 = arith.constant 0 : index
    %38 = vector.load %arg5[%c0_17, %c0_18] : memref<16x512xf32, #tpu.memory_space<vmem>>, vector<16x512xf32>
    %39 = vector.extract_strided_slice %38 {offsets = [0, 0], sizes = [16, 256], strides = [1, 1]} : vector<16x512xf32> to vector<16x256xf32>
    %cst_19 = arith.constant dense<0.000000e+00> : vector<16x128xf32>
    %40 = tpu.matmul %39, %36, %cst_19 {dimension_numbers = #tpu.dot_dimension_numbers<[1], [0], [0], [1], [0, 0, 1, 1], [], []>} : vector<16x256xf32>, vector<256x128xf32>, vector<16x128xf32> -> vector<16x128xf32>
    %41 = vector.extract_strided_slice %38 {offsets = [0, 256], sizes = [16, 256], strides = [1, 1]} : vector<16x512xf32> to vector<16x256xf32>
    %cst_20 = arith.constant dense<0.000000e+00> : vector<16x128xf32>
    %42 = tpu.matmul %41, %37, %cst_20 {dimension_numbers = #tpu.dot_dimension_numbers<[1], [0], [0], [1], [0, 0, 1, 1], [], []>} : vector<16x256xf32>, vector<256x128xf32>, vector<16x128xf32> -> vector<16x128xf32>
    %43 = arith.addf %40, %42 : vector<16x128xf32>
    %c32 = arith.constant 32 : index
    %c0_21 = arith.constant 0 : index
    %44 = vector.load %arg6[%c32, %c0_21] : memref<96x128xf32, #tpu.memory_space<vmem>>, vector<16x1xf32>
    %45 = vector.broadcast %44 : vector<16x1xf32> to vector<16x128xf32>
    %46 = arith.addf %43, %45 : vector<16x128xf32>
    %cst_22 = arith.constant 0.00999999977 : f32
    %47 = vector.broadcast %cst_22 : f32 to vector<16x128xf32>
    %48 = arith.mulf %47, %46 : vector<16x128xf32>
    %49 = arith.maximumf %46, %48 : vector<16x128xf32>
    %c0_23 = arith.constant 0 : index
    %c0_24 = arith.constant 0 : index
    %50 = vector.load %arg6[%c0_23, %c0_24] : memref<96x128xf32, #tpu.memory_space<vmem>>, vector<32x16xf32>
    %cst_25 = arith.constant dense<0.000000e+00> : vector<32x128xf32>
    %51 = tpu.matmul %50, %49, %cst_25 {dimension_numbers = #tpu.dot_dimension_numbers<[1], [0], [0], [1], [0, 0, 1, 1], [], []>} : vector<32x16xf32>, vector<16x128xf32>, vector<32x128xf32> -> vector<32x128xf32>
    %c48 = arith.constant 48 : index
    %c0_26 = arith.constant 0 : index
    %52 = vector.load %arg6[%c48, %c0_26] : memref<96x128xf32, #tpu.memory_space<vmem>>, vector<32x1xf32>
    %53 = vector.broadcast %52 : vector<32x1xf32> to vector<32x128xf32>
    %54 = arith.addf %51, %53 : vector<32x128xf32>
    %cst_27 = arith.constant 0.00999999977 : f32
    %55 = vector.broadcast %cst_27 : f32 to vector<32x128xf32>
    %56 = arith.mulf %55, %54 : vector<32x128xf32>
    %57 = arith.maximumf %54, %56 : vector<32x128xf32>
    %c80 = arith.constant 80 : index
    %c0_28 = arith.constant 0 : index
    %58 = vector.load %arg6[%c80, %c0_28] : memref<96x128xf32, #tpu.memory_space<vmem>>, vector<1x32xf32>
    %cst_29 = arith.constant dense<0.000000e+00> : vector<1x128xf32>
    %59 = tpu.matmul %58, %57, %cst_29 {dimension_numbers = #tpu.dot_dimension_numbers<[1], [0], [0], [1], [0, 0, 1, 1], [], []>} : vector<1x32xf32>, vector<32x128xf32>, vector<1x128xf32> -> vector<1x128xf32>
    %c88 = arith.constant 88 : index
    %c0_30 = arith.constant 0 : index
    %60 = vector.load %arg6[%c88, %c0_30] : memref<96x128xf32, #tpu.memory_space<vmem>>, vector<1x1xf32>
    %61 = vector.broadcast %60 : vector<1x1xf32> to vector<1x128xf32>
    %62 = arith.addf %59, %61 : vector<1x128xf32>
    %c0_31 = arith.constant 0 : index
    %c0_32 = arith.constant 0 : index
    %c0_33 = arith.constant 0 : index
    %63 = vector.load %arg7[%c0_31, %c0_32, %c0_33] : memref<1x1x128xf32, #tpu.memory_space<vmem>>, vector<1x1x128xf32>
    %64 = vector.shape_cast %63 : vector<1x1x128xf32> to vector<1x128xf32>
    %65 = vector.shape_cast %62 : vector<1x128xf32> to vector<1x1x128xf32>
    tpu.vector_store %arg7[%c0_31, %c0_32, %c0_33], %65 {strides = array<i32>} : memref<1x1x128xf32, #tpu.memory_space<vmem>>, vector<1x1x128xf32>,
    return
  }
  func.func @transform_0(%arg0: i32) -> (i32, i32) {
    %c0_i32 = arith.constant 0 : i32
    %c0_i32_0 = arith.constant 0 : i32
    %c0_i32_1 = arith.constant 0 : i32
    return %c0_i32, %c0_i32_0 : i32, i32
  }
  func.func @transform_1(%arg0: i32) -> (i32, i32, i32) {
    %c0_i32 = arith.constant 0 : i32
    %c0_i32_0 = arith.constant 0 : i32
    %c0_i32_1 = arith.constant 0 : i32
    %c0_i32_2 = arith.constant 0 : i32
    return %c0_i32, %c0_i32_0, %c0_i32_1 : i32, i32, i32
  }
  func.func @transform_2(%arg0: i32) -> (i32, i32, i32, i32) {
    %c0_i32 = arith.constant 0 : i32
    %c0_i32_0 = arith.constant 0 : i32
    %c0_i32_1 = arith.constant 0 : i32
    %c0_i32_2 = arith.constant 0 : i32
    return %c0_i32, %c0_i32_0, %c0_i32_1, %arg0 : i32, i32, i32, i32
  }
  func.func @transform_3(%arg0: i32) -> (i32, i32) {
    %c0_i32 = arith.constant 0 : i32
    %c0_i32_0 = arith.constant 0 : i32
    %c0_i32_1 = arith.constant 0 : i32
    return %c0_i32, %c0_i32_0 : i32, i32
  }
  func.func @transform_4(%arg0: i32) -> (i32, i32) {
    %c0_i32 = arith.constant 0 : i32
    %c0_i32_0 = arith.constant 0 : i32
    %c0_i32_1 = arith.constant 0 : i32
    return %c0_i32, %c0_i32_0 : i32, i32
  }
  func.func @transform_5(%arg0: i32) -> (i32, i32) {
    %c0_i32 = arith.constant 0 : i32
    %c0_i32_0 = arith.constant 0 : i32
    %c0_i32_1 = arith.constant 0 : i32
    return %c0_i32, %c0_i32_0 : i32, i32
  }
  func.func @transform_6(%arg0: i32) -> (i32, i32, i32) {
    %c0_i32 = arith.constant 0 : i32
    %c0_i32_0 = arith.constant 0 : i32
    %c0_i32_1 = arith.constant 0 : i32
    return %arg0, %c0_i32, %c0_i32_0 : i32, i32, i32
  }
}

</mosaic_0001>

<bundles_post_ra>
// kernel: nano_nnue_forward.1
= control target key start
LH: loop header
LB: loop body
LE: loop exit
PB: predicated region body
PF: predicated region fallthrough
CT: control target
= control target key end

     0   :  { %s3238_s0 = inlined_call_operand.<no memory space> [shape: f32[1,1], index: 0, kind: input, shape index: {}]   ;;  %s3239_s1 = inlined_call_operand.vmem [shape: f32[8,16,1], index: 1, kind: input, shape index: {}]   ;;  %s3240_s2 = inlined_call_operand.hbm [shape: f32[2,8,16,256], index: 2, kind: input, shape index: {}]   ;;  %s3241_s3 = inlined_call_operand.vmem [shape: f32[256,32], index: 3, kind: input, shape index: {}]   ;;  %s3242_s4 = inlined_call_operand.vmem [shape: f32[16,512], index: 4, kind: input, shape index: {}]   ;;  %s3243_s5 = inlined_call_operand.vmem [shape: f32[96,128], index: 5, kind: input, shape index: {}]   ;;  %s3244_s6 = inlined_call_operand.hbm [shape: f32[2,1,128], index: 6, kind: output, shape index: {}]  }
   0x1   :  { %11 = sst [smem:[#allocation2]] %s3238_s0 }
   0x2   :  { %12 = vsyncpa [#allocation4], 0 }
   0x3   :  { %14 = vsyncpa [#allocation4 + $0x1], 0 }
   0x4   :  { %15 = vsyncpa [#allocation5], 0 }
   0x5   :  { %17 = vsyncpa [#allocation5 + $0x1], 0  ;;  %s2255_s23 = smov 0   ;;  %s2257_s24 = smov 0  }
   0x6   :  { %s2259_s25 = smov 0   ;;  %s2261_s26 = smov 0  }
   0x7 LB: > { %s2276_s0 = sadd.s32 4294967295, %s2206_s26   ;;  %s1714_s27 = sadd.s32 4294967294, %s2206_s26   ;;  %s2206_s26 = sphi %s2261_s26, %s3283_s26   ;;  %s2202_s25 = sphi %s2259_s25, %s3282_s25   ;;  %s2198_s24 = sphi %s2257_s24, %s3281_s24   ;;  %s2194_s23 = sphi %s2255_s23, %s3280_s23  }
   0x8   : > { %s2280_s28 = sadd.s32 1, %s2206_s26   ;;  %s72_s29 = sadd.s32 1, %s2202_s25 }
   0x9   : > { %s69_s30 = ssub.s32 %s2206_s26, %s2280_s28  ;;  %p79_p0 = scmp.ne.s32.totalorder %s2202_s25, %s2198_s24 }
   0xa   : > { %p70_p1 = scmp.eq.s32.totalorder %s69_s30, 0  ;;  %p80_p2 = scmp.eq.s32.totalorder %s2206_s26, 0 }
   0xb   : > { %p85_p3 = scmp.ne.s32.totalorder %s2198_s24, %s2194_s23  ;;  %p86_p4 = scmp.eq.s32.totalorder %s2276_s0, 0 }
   0xc   : > { %s2292_s7 = scalar_select %p70_p1, %s2202_s25, %s72_s29  }
   0xd   : > { %p2294_p5 = por %p80_p2, %p79_p0  ;;  %p2298_p6 = por %p86_p4, %p85_p3 }
   0xe   : > { %p172_p7 = scmp.eq.s32.totalorder %s2276_s0, 1  ;;  %p178_p8 = scmp.eq.s32.totalorder %s1714_s27, 1 }
   0xf   : > { %p1969_p10 = scmp.lt.s32.totalorder %s2206_s26, 2  ;;  %s213_s12 = sand.u32 1, %s2202_s25  }
  0x10   : > { %p2305_p11 = por %p172_p7, %p79_p0  ;;  %p2309_p12 = por %p178_p8, %p85_p3 }
  0x11   : > { %s1718_s13 = sshll.u32 %s2206_s26, 7  ;;  %s1717_s14 = sshll.u32 %s213_s12, 8 }
  0x12   : > { %s3252_s10 = scalar_select %p2305_p11, 1, 0 }
  0x13   : > { %s3253_s11 = scalar_select %p2309_p12, 1, 0 }
  0x14   : > { %s2318_s17 = scalar_lea.hbm %s3240_s2, %s1718_s13  ;;  %s217_s18 = scalar_lea.vmem [#allocation3], %s1717_s14 }
  0x15   : > { %s223_s19 = sshll.u32 %s217_s18, 4  ;;  %p2322_p13 = pnand %p1969_p10, %p2294_p5  ;;  %s2326_s19 = int_to_ptr.vmem [resolvable:$true] %s223_s19 }
  0x16   : > { %s2329_s21 = scalar_lea.sflag [#allocation4], %s213_s12  ;;  %s2110_s22 = scalar_lea.hbm %s2318_s17, 4096 }
  0x17   : > { %p2111_p1 = scmp.ne.s32.totalorder %s2318_s17, %s2110_s22  ;;  %p2112_p2 = pneg %p2322_p13 }
  0x18   : > { %s2115_s30 = scalar_lea.hbm %s3240_s2, 8192  ;;  %p2116_p5 = scmp.lt.u32.totalorder %s2318_s17, %s3240_s2 }
  0x19   : > { %p2113_p3 = pnand %p2112_p2, %p2111_p1  ;;  %p2117_p7 = scmp.lt.u32.totalorder %s2115_s30, %s2110_s22 }
  0x1a   : > { %p2119_p10 = scmp.lt.u32.totalorder %s2110_s22, %s2318_s17 }
  0x1b   : > { %p2114_p4 = pneg %p2113_p3  ;;  %p2118_p8 = por %p2117_p7, %p2116_p5 }
  0x1d   : > { %p2120_p9 = por %p2119_p10, %p2118_p8 }
  0x1f   : > { %p2121_p0 = pnand %p2120_p9, %p2114_p4 }
  0x21   : > { %2124 = shalt.err (!%p2121_p0)
}
  0x22   : > { %s2125_s12 = scalar_lea.vmem %s2326_s19, 4096  ;;  %s2208_s14 = smov [#allocation3]  }
  0x23   : > { %p2126_p1 = scmp.ne.s32.totalorder %s2326_s19, %s2125_s12  ;;  %s2130_s15 = sshll.u32 %s2208_s14, 4  ;;  %s2131_s15 = int_to_ptr.vmem [resolvable:$false] %s2130_s15 }
  0x24   : > { %s2132_s16 = scalar_lea.vmem %s2131_s15, 8192  ;;  %p2133_p11 = scmp.lt.s32.totalorder %s2326_s19, %s2131_s15 }
  0x25   : > { %p2128_p3 = pnand %p2126_p1, %p2112_p2  ;;  %p2134_p5 = scmp.lt.s32.totalorder %s2132_s16, %s2125_s12 }
  0x27   : > { %p2129_p12 = pneg %p2128_p3  ;;  %p2135_p7 = por %p2134_p5, %p2133_p11 }
  0x29   : > { %p2136_p8 = pnand %p2135_p7, %p2129_p12 }
  0x2b   : > { %2139 = shalt.err (!%p2136_p8)
}
  0x2c   : > { %s2209_s18 = smov 256   ;;  %s2210_s22 = smov 128  }
  0x2d   : > { %s2211_s27 = smov 8   ;;  %p231_p9 = scmp.lt.s32.totalorder %s2206_s26, 3 }
  0x2e   : > { %1964 = dma.hbm_to_vmem [thread:$0]  (!%p2322_p13), %s2318_s17, 4096, %s2326_s19, %s2329_s21, %s2209_s18, %s2210_s22, %s2211_s27  }
  0x2f   : > { %p3255_p0 = scmp.ge.s32.totalorder %s2206_s26, 1 }
  0x31   : > { %p232_p2 = pnand %p3255_p0, %p231_p9 }
  0x33   : > { %235 = sbr.rel (%p232_p2) target bundleno = 1371 (0x55b), region = 44 }
  0x3a   : > { %s2361_s29 = sand.u32 1, %s2198_s24  }
  0x3b   : > { %s1720_s30 = sshll.u32 %s2361_s29, 8  ;;  %s238_s8 = scalar_lea.sflag [#allocation4], %s2361_s29 }
  0x3c   : > { %s2365_s13 = scalar_lea.vmem [#allocation3], %s1720_s30 }
  0x3d   : > { %2185 = dma.done.wait (%p2298_p6), %s238_s8, 4096  }
  0x3e   : > { %2187 = vsyncadd (%p2298_p6), %s238_s8, 4294963200  ;;  %v2212_v0 = vmov 0   ;;  %s269_s17 = sld [smem:[#allocation2]]  ;;  %v275_v1 = vld [vmem:[%s3239_s1 + $0x10] sm:$0xff]  ;;  %v273_v2 = vld [vmem:[%s3239_s1] sm:$0xff]  ;;  %v3246_v59 = vmov 0.0  }
  0x3f   : > { %2011 = vset.pattern.permute.xlu1 %v2212_v0  ;;  %2010 = vset.pattern.permute.xlu0 %v2212_v0  ;;  %v276_v4 = vld [vmem:[%s3239_s1 + $0x18] sm:$0xff]  ;;  %v274_v5 = vld [vmem:[%s3239_s1 + $0x8] sm:$0xff]  ;;  %v277_v7 = vld [vmem:[%s3239_s1 + $0x20] sm:$0xff]  ;;  %vm890_vm0 = vcmask 261120   ;;  %vm1448_vm1 = vcmask 130048   ;;  %vm2215_vm2 = vmmov 0  }
  0x40   : > { %333 = vperm.xlu1 %2011, %v275_v1   ;;  %323 = vperm.xlu0 %2010, %v273_v2   ;;  %v278_v6 = vld [vmem:[%s3239_s1 + $0x28] sm:$0xff]  ;;  %v280_v8 = vld [vmem:[%s3239_s1 + $0x38] sm:$0xff]  ;;  %v279_v9 = vld [vmem:[%s3239_s1 + $0x30] sm:$0xff]  ;;  %s268_s15 = scalar_lea.vmem [#allocation6], %s2361_s29  ;;  %s1636_s27 = scalar_lea.sflag [#allocation5], %s2361_s29 }
  0x41   : > { %v282_v11 = vld [vmem:[%s3239_s1 + $0x48] sm:$0xff]  ;;  %v281_v12 = vld [vmem:[%s3239_s1 + $0x40] sm:$0xff]  ;;  %v284_v13 = vld [vmem:[%s3239_s1 + $0x58] sm:$0xff]  ;;  %1051 = vmatprep.mubr.f32.mxu0 %v3246_v59  ;;  %1189 = vmatprep.mubr.f32.mxu1 %v3246_v59  ;;  %s1648_s9 = sshll.u32 %s268_s15, 4  ;;  %p3277_p11 = scmp.ne.s32.totalorder %s3252_s10, 0  ;;  %s3196_s9 = int_to_ptr.vmem [resolvable:$true] %s1648_s9 }
  0x42   : > { %v283_v14 = vld [vmem:[%s3239_s1 + $0x50] sm:$0xff]  ;;  %v286_v15 = vld [vmem:[%s3239_s1 + $0x68] sm:$0xff]  ;;  %v285_v16 = vld [vmem:[%s3239_s1 + $0x60] sm:$0xff]  ;;  %s2140_s30 = scalar_lea.vmem %s3196_s9, 16 }
  0x43   : > { %v288_v17 = vld [vmem:[%s3239_s1 + $0x78] sm:$0xff]  ;;  %v287_v18 = vld [vmem:[%s3239_s1 + $0x70] sm:$0xff]  ;;  %v1403_v19 = vld [vmem:[%s3243_s5 + $0x28] sm:$0xff]  ;;  %p2141_p6 = scmp.ne.s32.totalorder %s3196_s9, %s2140_s30 }
  0x44   : > { %v270_v3 = vstv %s269_s17  ;;  %338 = vperm.xlu1 %2011, %v276_v4   ;;  %328 = vperm.xlu0 %2010, %v274_v5   ;;  %v1402_v20 = vld [vmem:[%s3243_s5 + $0x20] sm:$0xff]  ;;  %v1425_v21 = vld [vmem:[%s3243_s5 + $0x38] sm:$0xff]  ;;  %v1424_v22 = vld [vmem:[%s3243_s5 + $0x30] sm:$0xff] }
  0x45   : > { %2012 = vrcp.f32 %v270_v3  ;;  %v1427_v23 = vld [vmem:[%s3243_s5 + $0x48] sm:$0xff]  ;;  %v1426_v24 = vld [vmem:[%s3243_s5 + $0x40] sm:$0xff]  ;;  %v1555_v25 = vld [vmem:[%s3243_s5 + $0x58] sm:$0x1]  ;;  %p2142_p12 = pnand %p2141_p6, %p3277_p11 }
  0x46   : > { %v289_v26 = vld [vmem:[%s2365_s13] sm:$0xff]  ;;  %v291_v27 = vld [vmem:[%s2365_s13 + $0x10] sm:$0xff]  ;;  %v292_v34 = vld [vmem:[%s2365_s13 + $0x18] sm:$0xff] }
  0x47   : > { %v307_v28 = vld [vmem:[%s2365_s13 + $0x90] sm:$0xff]  ;;  %v305_v29 = vld [vmem:[%s2365_s13 + $0x80] sm:$0xff]  ;;  %v308_v38 = vld [vmem:[%s2365_s13 + $0x98] sm:$0xff]  ;;  %p2143_p13 = pneg %p2142_p12 }
  0x48   : > { %348 = vperm.xlu1 %2011, %v278_v6   ;;  %343 = vperm.xlu0 %2010, %v277_v7   ;;  %v290_v39 = vld [vmem:[%s2365_s13 + $0x8] sm:$0xff]  ;;  %v293_v57 = vld [vmem:[%s2365_s13 + $0x20] sm:$0xff] }
  0x49   : > { %v306_v40 = vld [vmem:[%s2365_s13 + $0x88] sm:$0xff]  ;;  %v309_v58 = vld [vmem:[%s2365_s13 + $0xa0] sm:$0xff] }
  0x4a   : > { %v294_v51 = vld [vmem:[%s2365_s13 + $0x28] sm:$0xff] }
  0x4b   : > { %v310_v56 = vld [vmem:[%s2365_s13 + $0xa8] sm:$0xff] }
  0x4c   : > { %358 = vperm.xlu1 %2011, %v280_v8   ;;  %353 = vperm.xlu0 %2010, %v279_v9  }
  0x4f   : > { %v2013_v10 = vpop.eup %2012 }
  0x50   : > { %1955 = vpush %v2013_v10  ;;  %368 = vperm.xlu1 %2011, %v282_v11   ;;  %363 = vperm.xlu0 %2010, %v281_v12   ;;  %v296_v10 = vld [vmem:[%s2365_s13 + $0x38] sm:$0xff] }
  0x51   : > { %v312_v11 = vld [vmem:[%s2365_s13 + $0xb8] sm:$0xff] }
  0x54   : > { %378 = vperm.xlu1 %2011, %v284_v13   ;;  %373 = vperm.xlu0 %2010, %v283_v14  }
  0x58   : > { %388 = vperm.xlu1 %2011, %v286_v15   ;;  %383 = vperm.xlu0 %2010, %v285_v16  }
  0x5c   : > { %398 = vperm.xlu1 %2011, %v288_v17   ;;  %393 = vperm.xlu0 %2010, %v287_v18  }
  0x60   : > { %1411 = vperm.xlu1 %2011, %v1403_v19   ;;  %1406 = vperm.xlu0 %2010, %v1402_v20  }
  0x64   : > { %1435 = vperm.xlu1 %2011, %v1425_v21   ;;  %1430 = vperm.xlu0 %2010, %v1424_v22  }
  0x68   : > { %1445 = vperm.xlu1 %2011, %v1427_v23   ;;  %1440 = vperm.xlu0 %2010, %v1426_v24  }
  0x6c   : > { %1558 = vperm.xlu0 %2010, %v1555_v25  }
  0x81   : > { %s1956_s14 = spop %1955 }
  0x82   : > { %v2444_v33 = vstv %s1956_s14 }
  0xbf   : > { %v334_v30 = vpop.permute.xlu1 %333  ;;  %v324_v31 = vpop.permute.xlu0 %323 }
  0xc0   : > { %v401_v32 = vadd.f32 %v324_v31, %v289_v26  ;;  %v403_v35 = vadd.f32 %v334_v30, %v291_v27  ;;  %v419_v36 = vadd.f32 %v334_v30, %v307_v28  ;;  %v417_v37 = vadd.f32 %v324_v31, %v305_v29  ;;  %v295_v29 = vld [vmem:[%s2365_s13 + $0x30] sm:$0xff] }
  0xc1   : > { %v311_v30 = vld [vmem:[%s2365_s13 + $0xb0] sm:$0xff] }
  0xc2   : > { %v2451_v41 = vmul.f32 %v2444_v33, %v401_v32  ;;  %v2454_v48 = vmul.f32 %v2444_v33, %v403_v35  ;;  %v2457_v49 = vmul.f32 %v2444_v33, %v417_v37  ;;  %v2460_v50 = vmul.f32 %v2444_v33, %v419_v36 }
  0xc3   : > { %v339_v42 = vpop.permute.xlu1 %338  ;;  %v329_v43 = vpop.permute.xlu0 %328 }
  0xc4   : > { %v404_v44 = vadd.f32 %v339_v42, %v292_v34  ;;  %v420_v45 = vadd.f32 %v339_v42, %v308_v38  ;;  %v402_v46 = vadd.f32 %v329_v43, %v290_v39  ;;  %v418_v47 = vadd.f32 %v329_v43, %v306_v40 }
  0xc6   : > { %v2464_v52 = vmul.f32 %v2444_v33, %v404_v44  ;;  %v2467_v53 = vmul.f32 %v2444_v33, %v420_v45  ;;  %v2470_v54 = vmul.f32 %v2444_v33, %v402_v46  ;;  %v2473_v55 = vmul.f32 %v2444_v33, %v418_v47 }
  0xc7   : > { %v349_v60 = vpop.permute.xlu1 %348  ;;  %v344_v61 = vpop.permute.xlu0 %343 }
  0xc8   : > { %v473_v62 = vmax.f32 %v2454_v48, %v2464_v52  ;;  %v529_v63 = vmax.f32 %v2460_v50, %v2467_v53  ;;  %v466_v0 = vmax.f32 %v2451_v41, %v2470_v54  ;;  %v522_v1 = vmax.f32 %v2457_v49, %v2473_v55 }
  0xc9   : > { %v406_v2 = vadd.f32 %v349_v60, %v294_v51  ;;  %v422_v3 = vadd.f32 %v349_v60, %v310_v56  ;;  %v405_v4 = vadd.f32 %v344_v61, %v293_v57  ;;  %v421_v5 = vadd.f32 %v344_v61, %v309_v58 }
  0xca   : > { %v474_v6 = vrot.slane %v473_v62, 4  ;;  %v530_v7 = vrot.slane %v529_v63, 4  ;;  %v467_v8 = vrot.slane %v466_v0, 4  ;;  %v523_v9 = vrot.slane %v522_v1, 4 }
  0xcb   : > { %v2491_v12 = vmul.f32 %v2444_v33, %v406_v2  ;;  %v2494_v13 = vmul.f32 %v2444_v33, %v422_v3  ;;  %v2497_v14 = vmul.f32 %v2444_v33, %v405_v4  ;;  %v2500_v15 = vmul.f32 %v2444_v33, %v421_v5  ;;  %v359_v16 = vpop.permute.xlu1 %358  ;;  %v354_v31 = vpop.permute.xlu0 %353 }
  0xcc   : > { %v475_v17 = vmax.f32 %v473_v62, %v474_v6  ;;  %v531_v18 = vmax.f32 %v529_v63, %v530_v7  ;;  %v468_v19 = vmax.f32 %v466_v0, %v467_v8  ;;  %v524_v20 = vmax.f32 %v522_v1, %v523_v9  ;;  %v298_v6 = vld [vmem:[%s2365_s13 + $0x48] sm:$0xff] }
  0xcd   : > { %v480_v21 = vmax.f32 %v2497_v14, %v2491_v12  ;;  %v536_v22 = vmax.f32 %v2500_v15, %v2494_v13  ;;  %v408_v23 = vadd.f32 %v359_v16, %v296_v10  ;;  %v424_v24 = vadd.f32 %v359_v16, %v312_v11  ;;  %v314_v16 = vld [vmem:[%s2365_s13 + $0xc8] sm:$0xff] }
  0xce   : > { %v476_v25 = vrot.slane %v475_v17, 2  ;;  %v532_v26 = vrot.slane %v531_v18, 2  ;;  %v469_v27 = vrot.slane %v468_v19, 2  ;;  %v525_v28 = vrot.slane %v524_v20, 2 }
  0xcf   : > { %v481_v32 = vrot.slane %v480_v21, 4  ;;  %v537_v34 = vrot.slane %v536_v22, 4  ;;  %v2509_v35 = vmul.f32 %v2444_v33, %v408_v23  ;;  %v2512_v36 = vmul.f32 %v2444_v33, %v424_v24  ;;  %v369_v7 = vpop.permute.xlu1 %368 }
  0xd0   : > { %v477_v37 = vmax.f32 %v475_v17, %v476_v25  ;;  %v533_v38 = vmax.f32 %v531_v18, %v532_v26  ;;  %v470_v39 = vmax.f32 %v468_v19, %v469_v27  ;;  %v526_v40 = vmax.f32 %v524_v20, %v525_v28 }
  0xd1   : > { %v482_v42 = vmax.f32 %v480_v21, %v481_v32  ;;  %v538_v43 = vmax.f32 %v536_v22, %v537_v34  ;;  %v407_v44 = vadd.f32 %v354_v31, %v295_v29  ;;  %v423_v45 = vadd.f32 %v354_v31, %v311_v30  ;;  %v364_v29 = vpop.permute.xlu0 %363 }
  0xd2   : > { %v478_v46 = vrot.slane %v477_v37, 1  ;;  %v534_v47 = vrot.slane %v533_v38, 1  ;;  %v471_v51 = vrot.slane %v470_v39, 1  ;;  %v527_v56 = vrot.slane %v526_v40, 1 }
  0xd3   : > { %v483_v57 = vrot.slane %v482_v42, 2  ;;  %v539_v58 = vrot.slane %v538_v43, 2  ;;  %v2515_v60 = vmul.f32 %v2444_v33, %v407_v44  ;;  %v2518_v61 = vmul.f32 %v2444_v33, %v423_v45  ;;  %v313_v45 = vld [vmem:[%s2365_s13 + $0xc0] sm:$0xff] }
  0xd4   : > { %v479_v62 = vmax.f32 %v477_v37, %v478_v46  ;;  %v535_v63 = vmax.f32 %v533_v38, %v534_v47  ;;  %v472_v0 = vmax.f32 %v470_v39, %v471_v51  ;;  %v528_v1 = vmax.f32 %v526_v40, %v527_v56  ;;  %v300_v46 = vld [vmem:[%s2365_s13 + $0x58] sm:$0xff] }
  0xd5   : > { %v484_v2 = vmax.f32 %v482_v42, %v483_v57  ;;  %v540_v3 = vmax.f32 %v538_v43, %v539_v58  ;;  %v487_v4 = vmax.f32 %v2515_v60, %v2509_v35  ;;  %v543_v5 = vmax.f32 %v2518_v61, %v2512_v36  ;;  %v316_v57 = vld [vmem:[%s2365_s13 + $0xd8] sm:$0xff]  ;;  %v379_v58 = vpop.permute.xlu1 %378 }
  0xd6   : > { %v580_v8 = vsub.f32 %v2454_v48, %v479_v62  ;;  %v581_v9 = vsub.f32 %v2464_v52, %v479_v62  ;;  %v596_v10 = vsub.f32 %v2460_v50, %v535_v63  ;;  %v597_v11 = vsub.f32 %v2467_v53, %v535_v63 }
  0xd7   : > { %v578_v17 = vsub.f32 %v2451_v41, %v472_v0  ;;  %v579_v18 = vsub.f32 %v2470_v54, %v472_v0  ;;  %v594_v19 = vsub.f32 %v2457_v49, %v528_v1  ;;  %v595_v20 = vsub.f32 %v2473_v55, %v528_v1  ;;  %v297_v49 = vld [vmem:[%s2365_s13 + $0x40] sm:$0xff] }
  0xd8   : > { %v614_v21 = vmul.f32 1.442695, %v580_v8  ;;  %v616_v22 = vmul.f32 1.442695, %v581_v9  ;;  %v646_v23 = vmul.f32 1.442695, %v596_v10  ;;  %v410_v48 = vadd.f32 %v369_v7, %v298_v6 }
  0xd9   : > { %v648_v24 = vmul.f32 1.442695, %v597_v11  ;;  %v610_v52 = vmul.f32 1.442695, %v578_v17  ;;  %v612_v25 = vmul.f32 1.442695, %v579_v18  ;;  %v426_v50 = vadd.f32 %v369_v7, %v314_v16 }
  0xda   : > { %2014 = vpow2.f32 %v614_v21  ;;  %v642_v53 = vmul.f32 1.442695, %v594_v19  ;;  %v644_v26 = vmul.f32 1.442695, %v595_v20  ;;  %v485_v27 = vrot.slane %v484_v2, 1 }
  0xdb   : > { %2016 = vpow2.f32 %v616_v22  ;;  %v541_v41 = vrot.slane %v540_v3, 1  ;;  %v488_v54 = vrot.slane %v487_v4, 4  ;;  %v544_v28 = vrot.slane %v543_v5, 4 }
  0xdc   : > { %2018 = vpow2.f32 %v646_v23  ;;  %v486_v55 = vmax.f32 %v484_v2, %v485_v27  ;;  %v2536_v30 = vmul.f32 %v2444_v33, %v410_v48  ;;  %v2539_v31 = vmul.f32 %v2444_v33, %v426_v50  ;;  %v299_v23 = vld [vmem:[%s2365_s13 + $0x50] sm:$0xff]  ;;  %v374_v48 = vpop.permute.xlu0 %373 }
  0xdd   : > { %2020 = vpow2.f32 %v648_v24  ;;  %v542_v32 = vmax.f32 %v540_v3, %v541_v41  ;;  %v489_v34 = vmax.f32 %v487_v4, %v488_v54  ;;  %v545_v37 = vmax.f32 %v543_v5, %v544_v28  ;;  %v315_v54 = vld [vmem:[%s2365_s13 + $0xd0] sm:$0xff] }
  0xde   : > { %2022 = vpow2.f32 %v610_v52  ;;  %v582_v38 = vsub.f32 %v2497_v14, %v486_v55  ;;  %v583_v39 = vsub.f32 %v2491_v12, %v486_v55  ;;  %v409_v40 = vadd.f32 %v364_v29, %v297_v49 }
  0xdf   : > { %2024 = vpow2.f32 %v612_v25  ;;  %v598_v42 = vsub.f32 %v2500_v15, %v542_v32  ;;  %v599_v43 = vsub.f32 %v2494_v13, %v542_v32  ;;  %v490_v44 = vrot.slane %v489_v34, 2 }
  0xe0   : > { %2026 = vpow2.f32 %v642_v53  ;;  %v618_v47 = vmul.f32 1.442695, %v582_v38  ;;  %v620_v51 = vmul.f32 1.442695, %v583_v39  ;;  %v546_v56 = vrot.slane %v545_v37, 2 }
  0xe1   : > { %2028 = vpow2.f32 %v644_v26  ;;  %v650_v62 = vmul.f32 1.442695, %v598_v42  ;;  %v652_v14 = vmul.f32 1.442695, %v599_v43  ;;  %v491_v63 = vmax.f32 %v489_v34, %v490_v44 }
  0xe2   : > { %2030 = vpow2.f32 %v618_v47  ;;  %v547_v12 = vmax.f32 %v545_v37, %v546_v56  ;;  %v425_v0 = vadd.f32 %v364_v29, %v313_v45  ;;  %v2549_v15 = vmul.f32 %v2444_v33, %v409_v40 }
  0xe3   : > { %2032 = vpow2.f32 %v620_v51  ;;  %v492_v13 = vrot.slane %v491_v63, 1  ;;  %v412_v1 = vadd.f32 %v379_v58, %v300_v46  ;;  %v428_v2 = vadd.f32 %v379_v58, %v316_v57 }
  0xe4   : > { %v2551_v3 = vpop.eup %2014  ;;  %2034 = vpow2.f32 %v650_v62  ;;  %v548_v4 = vrot.slane %v547_v12, 1  ;;  %v2554_v5 = vmul.f32 %v2444_v33, %v425_v0  ;;  %v494_v6 = vmax.f32 %v2549_v15, %v2536_v30 }
  0xe5   : > { %v2558_v7 = vpop.eup %2016  ;;  %2036 = vpow2.f32 %v652_v14  ;;  %v493_v8 = vmax.f32 %v491_v63, %v492_v13  ;;  %v2571_v21 = vmul.f32 %v2444_v33, %v412_v1  ;;  %v2574_v22 = vmul.f32 %v2444_v33, %v428_v2 }
  0xe6   : > { %v2560_v9 = vpop.eup %2018  ;;  %v681_v10 = vadd.f32 %v2558_v7, %v2551_v3  ;;  %v549_v11 = vmax.f32 %v547_v12, %v548_v4  ;;  %v495_v16 = vrot.slane %v494_v6, 4  ;;  %v550_v17 = vmax.f32 %v2554_v5, %v2539_v31 }
  0xe7   : > { %v2566_v18 = vpop.eup %2020  ;;  %v584_v19 = vsub.f32 %v2515_v60, %v493_v8  ;;  %v585_v20 = vsub.f32 %v2509_v35, %v493_v8  ;;  %v411_v32 = vadd.f32 %v374_v48, %v299_v23  ;;  %v427_v43 = vadd.f32 %v374_v48, %v315_v54 }
  0xe8   : > { %v2577_v24 = vpop.eup %2022  ;;  %v682_v52 = vrot.slane %v681_v10, 4  ;;  %v737_v25 = vadd.f32 %v2566_v18, %v2560_v9  ;;  %v600_v50 = vsub.f32 %v2518_v61, %v549_v11  ;;  %v601_v60 = vsub.f32 %v2512_v36, %v549_v11 }
  0xe9   : > { %v2583_v53 = vpop.eup %2024  ;;  %v622_v35 = vmul.f32 1.442695, %v584_v19  ;;  %v624_v26 = vmul.f32 1.442695, %v585_v20  ;;  %v496_v27 = vmax.f32 %v494_v6, %v495_v16  ;;  %v551_v41 = vrot.slane %v550_v17, 4  ;;  %v389_v20 = vpop.permute.xlu1 %388 }
  0xea   : > { %v2586_v28 = vpop.eup %2026  ;;  %v683_v49 = vadd.f32 %v682_v52, %v681_v10  ;;  %v738_v29 = vrot.slane %v737_v25, 4  ;;  %v674_v55 = vadd.f32 %v2583_v53, %v2577_v24  ;;  %v654_v61 = vmul.f32 1.442695, %v600_v50 }
  0xeb   : > { %v2590_v34 = vpop.eup %2028  ;;  %2038 = vpow2.f32 %v622_v35  ;;  %v497_v36 = vrot.slane %v496_v27, 2  ;;  %v552_v37 = vmax.f32 %v550_v17, %v551_v41  ;;  %v656_v45 = vmul.f32 1.442695, %v601_v60 }
  0xec   : > { %v2592_v38 = vpop.eup %2030  ;;  %v739_v39 = vadd.f32 %v738_v29, %v737_v25  ;;  %v675_v40 = vrot.slane %v674_v55, 4  ;;  %v730_v42 = vadd.f32 %v2590_v34, %v2586_v28  ;;  %2040 = vpow2.f32 %v624_v26  ;;  %v384_v29 = vpop.permute.xlu0 %383 }
  0xed   : > { %v2596_v44 = vpop.eup %2032  ;;  %v498_v46 = vmax.f32 %v496_v27, %v497_v36  ;;  %v553_v47 = vrot.slane %v552_v37, 2  ;;  %v684_v56 = vrot.slane %v683_v49, 2  ;;  %2042 = vpow2.f32 %v654_v61  ;;  %v302_v27 = vld [vmem:[%s2365_s13 + $0x68] sm:$0xff] }
  0xee   : > { %v2598_v51 = vpop.eup %2034  ;;  %v740_v57 = vrot.slane %v739_v39, 2  ;;  %v676_v58 = vadd.f32 %v675_v40, %v674_v55  ;;  %v731_v62 = vrot.slane %v730_v42, 4  ;;  %v688_v63 = vadd.f32 %v2596_v44, %v2592_v38 }
  0xef   : > { %v2600_v14 = vpop.eup %2036  ;;  %v499_v12 = vrot.slane %v498_v46, 1  ;;  %v554_v0 = vmax.f32 %v552_v37, %v553_v47  ;;  %v2607_v4 = vmul.f32 %v2444_v33, %v411_v32  ;;  %2044 = vpow2.f32 %v656_v45  ;;  %v318_v37 = vld [vmem:[%s2365_s13 + $0xe8] sm:$0xff]  ;;  %v317_v47 = vld [vmem:[%s2365_s13 + $0xe0] sm:$0xff] }
  0xf0   : > { %v677_v13 = vrot.slane %v676_v58, 2  ;;  %v732_v1 = vadd.f32 %v731_v62, %v730_v42  ;;  %v744_v2 = vadd.f32 %v2600_v14, %v2598_v51  ;;  %v689_v6 = vrot.slane %v688_v63, 4 }
  0xf1   : > { %v500_v8 = vmax.f32 %v498_v46, %v499_v12  ;;  %v555_v10 = vrot.slane %v554_v0, 1  ;;  %v2609_v11 = vadd.f32 %v684_v56, %v683_v49  ;;  %v2612_v19 = vmul.f32 %v2444_v33, %v427_v43  ;;  %v304_v56 = vld [vmem:[%s2365_s13 + $0x78] sm:$0xff] }
  0xf2   : > { %v733_v16 = vrot.slane %v732_v1, 2  ;;  %v745_v17 = vrot.slane %v744_v2, 4  ;;  %v2614_v23 = vadd.f32 %v740_v57, %v739_v39  ;;  %v2618_v50 = vadd.f32 %v677_v13, %v676_v58  ;;  %v301_v39 = vld [vmem:[%s2365_s13 + $0x60] sm:$0xff]  ;;  %v399_v57 = vpop.permute.xlu1 %398 }
  0xf3   : > { %v556_v48 = vmax.f32 %v554_v0, %v555_v10  ;;  %v586_v52 = vsub.f32 %v2549_v15, %v500_v8  ;;  %v587_v25 = vsub.f32 %v2536_v30, %v500_v8  ;;  %v2620_v60 = vadd.f32 %v689_v6, %v688_v63 }
  0xf4   : > { %v501_v35 = vmax.f32 %v2607_v4, %v2571_v21  ;;  %v557_v26 = vmax.f32 %v2612_v19, %v2574_v22  ;;  %v2629_v54 = vadd.f32 %v733_v16, %v732_v1  ;;  %v2633_v55 = vadd.f32 %v745_v17, %v744_v2  ;;  %v320_v2 = vld [vmem:[%s2365_s13 + $0xf8] sm:$0xff] }
  0xf5   : > { %v2627_v41 = vpop.eup %2038  ;;  %v602_v15 = vsub.f32 %v2554_v5, %v556_v48  ;;  %v603_v30 = vsub.f32 %v2539_v31, %v556_v48  ;;  %v626_v49 = vmul.f32 1.442695, %v586_v52  ;;  %v628_v32 = vmul.f32 1.442695, %v587_v25  ;;  %v394_v48 = vpop.permute.xlu0 %393 }
  0xf6   : > { %v502_v61 = vrot.slane %v501_v35, 4  ;;  %v558_v36 = vrot.slane %v557_v26, 4  ;;  %v2637_v40 = vpop.eup %2040  ;;  %v414_v45 = vadd.f32 %v389_v20, %v302_v27  ;;  %v430_v62 = vadd.f32 %v389_v20, %v318_v37  ;;  %v303_v20 = vld [vmem:[%s2365_s13 + $0x70] sm:$0xff] }
  0xf7   : > { %2046 = vpow2.f32 %v626_v49  ;;  %v658_v42 = vmul.f32 1.442695, %v602_v15  ;;  %v660_v43 = vmul.f32 1.442695, %v603_v30  ;;  %v2641_v31 = vadd.f32 %v2637_v40, %v2627_v41  ;;  %v2645_v58 = vpop.eup %2042  ;;  %v319_v27 = vld [vmem:[%s2365_s13 + $0xf0] sm:$0xff]  ;;  %s1758_s13 = sshll.u32 %s2276_s0, 4 }
  0xf8   : > { %2048 = vpow2.f32 %v628_v32  ;;  %v503_v5 = vmax.f32 %v501_v35, %v502_v61  ;;  %v559_v46 = vmax.f32 %v557_v26, %v558_v36  ;;  %v2648_v63 = vmul.f32 %v2444_v33, %v414_v45  ;;  %s3194_s22 = scalar_lea.hbm %s3244_s6, %s1758_s13  ;;  %s2216_s0 = smov [#allocation6]  }
  0xf9   : > { %2050 = vpow2.f32 %v658_v42  ;;  %v413_v12 = vadd.f32 %v384_v29, %v301_v39  ;;  %v2652_v6 = vpop.eup %2044  ;;  %v2655_v8 = vmul.f32 %v2444_v33, %v430_v62  ;;  %v429_v10 = vadd.f32 %v384_v29, %v317_v47  ;;  %s2144_s8 = sshll.u32 %s2216_s0, 4  ;;  %s2145_s8 = int_to_ptr.vmem [resolvable:$false] %s2144_s8 }
  0xfa   : > { %2052 = vpow2.f32 %v660_v43  ;;  %v504_v13 = vrot.slane %v503_v5, 2  ;;  %v560_v1 = vrot.slane %v559_v46, 2  ;;  %v416_v17 = vadd.f32 %v399_v57, %v304_v56  ;;  %s2146_s17 = scalar_lea.vmem %s2145_s8, 32  ;;  %p2147_p4 = scmp.lt.s32.totalorder %s3196_s9, %s2145_s8 }
  0xfb   : > { %v2658_v16 = vmul.f32 %v2444_v33, %v413_v12  ;;  %v2664_v25 = vadd.f32 %v2652_v6, %v2645_v58  ;;  %v696_v15 = vrot.slane %v2641_v31, 4  ;;  %v2669_v30 = vmul.f32 %v2444_v33, %v429_v10  ;;  %p2148_p10 = scmp.lt.s32.totalorder %s2146_s17, %s2140_s30 }
  0xfc   : > { %v505_v35 = vmax.f32 %v503_v5, %v504_v13  ;;  %v561_v26 = vmax.f32 %v559_v46, %v560_v1  ;;  %v432_v29 = vadd.f32 %v399_v57, %v320_v2  ;;  %v2674_v36 = vmul.f32 %v2444_v33, %v416_v17 }
  0xfd   : > { %v508_v49 = vmax.f32 %v2658_v16, %v2648_v63  ;;  %v415_v37 = vadd.f32 %v394_v48, %v303_v20  ;;  %v752_v39 = vrot.slane %v2664_v25, 4  ;;  %v564_v43 = vmax.f32 %v2669_v30, %v2655_v8  ;;  %p2149_p1 = por %p2148_p10, %p2147_p4 }
  0xfe   : > { %v506_v32 = vrot.slane %v505_v35, 1  ;;  %v562_v61 = vrot.slane %v561_v26, 1  ;;  %v431_v45 = vadd.f32 %v394_v48, %v319_v27  ;;  %v2680_v47 = vmul.f32 %v2444_v33, %v432_v29 }
  0xff   : > { %v509_v42 = vrot.slane %v508_v49, 4  ;;  %v2683_v56 = vmul.f32 %v2444_v33, %v415_v37  ;;  %v565_v12 = vrot.slane %v564_v43, 4  ;;  %v735_v1 = vrot.slane %v2629_v54, 1  ;;  %p2150_p3 = pnand %p2149_p1, %p2143_p13 }
 0x100   : > { %v507_v5 = vmax.f32 %v505_v35, %v506_v32  ;;  %v563_v46 = vmax.f32 %v561_v26, %v562_v61  ;;  %v2688_v13 = vmul.f32 %v2444_v33, %v431_v45 }
 0x101   : > { %v2685_v57 = vpop.eup %2046  ;;  %v510_v62 = vmax.f32 %v508_v49, %v509_v42  ;;  %v566_v33 = vmax.f32 %v564_v43, %v565_v12  ;;  %v515_v49 = vmax.f32 %v2683_v56, %v2674_v36 }
 0x102   : > { %v2691_v2 = vpop.eup %2048  ;;  %v588_v10 = vsub.f32 %v2607_v4, %v507_v5  ;;  %v589_v17 = vsub.f32 %v2571_v21, %v507_v5  ;;  %v604_v20 = vsub.f32 %v2612_v19, %v563_v46  ;;  %v605_v48 = vsub.f32 %v2574_v22, %v563_v46 }
 0x103   : > { %3256 = vst [vmem:[#allocation9_spill] sm:$0xff] %v2691_v2  ;;  %v2697_v35 = vpop.eup %2050  ;;  %v702_v26 = vadd.f32 %v2691_v2, %v2685_v57  ;;  %v511_v27 = vrot.slane %v510_v62, 2  ;;  %v571_v21 = vmax.f32 %v2688_v13, %v2680_v47  ;;  %v567_v45 = vrot.slane %v566_v33, 2 }
 0x104   : > { %v2703_v29 = vpop.eup %2052  ;;  %v630_v32 = vmul.f32 1.442695, %v588_v10  ;;  %v632_v4 = vmul.f32 1.442695, %v589_v17  ;;  %v662_v61 = vmul.f32 1.442695, %v604_v20 }
 0x105   : > { %3257 = vst [vmem:[#allocation10_spill] sm:$0xff] %v2703_v29  ;;  %v703_v19 = vrot.slane %v702_v26, 4  ;;  %v758_v22 = vadd.f32 %v2703_v29, %v2697_v35  ;;  %v664_v37 = vmul.f32 1.442695, %v605_v48  ;;  %v512_v42 = vmax.f32 %v510_v62, %v511_v27 }
 0x106   : > { %2054 = vpow2.f32 %v630_v32  ;;  %v516_v43 = vrot.slane %v515_v49, 4  ;;  %v572_v5 = vrot.slane %v571_v21, 4  ;;  %v568_v10 = vmax.f32 %v566_v33, %v567_v45 }
 0x107   : > { %v704_v46 = vadd.f32 %v703_v19, %v702_v26  ;;  %v759_v12 = vrot.slane %v758_v22, 4  ;;  %2056 = vpow2.f32 %v632_v4  ;;  %v513_v59 = vrot.slane %v512_v42, 1 }
 0x108   : > { %2058 = vpow2.f32 %v662_v61  ;;  %v517_v17 = vmax.f32 %v515_v49, %v516_v43  ;;  %v573_v20 = vmax.f32 %v571_v21, %v572_v5  ;;  %v2710_v29 = vadd.f32 %v696_v15, %v2641_v31 }
 0x109   : > { %v705_v0 = vrot.slane %v704_v46, 2  ;;  %v760_v52 = vadd.f32 %v759_v12, %v758_v22  ;;  %2060 = vpow2.f32 %v664_v37  ;;  %v514_v2 = vmax.f32 %v512_v42, %v513_v59 }
 0x10a   : > { %v569_v62 = vrot.slane %v568_v10, 1  ;;  %v518_v48 = vrot.slane %v517_v17, 2  ;;  %v574_v27 = vrot.slane %v573_v20, 2  ;;  %v753_v32 = vadd.f32 %v752_v39, %v2664_v25 }
 0x10b   : > { %v761_v26 = vrot.slane %v760_v52, 2  ;;  %v590_v4 = vsub.f32 %v2658_v16, %v514_v2  ;;  %v591_v61 = vsub.f32 %v2648_v63, %v514_v2  ;;  %v742_v19 = vrot.slane %v2614_v23, 1 }
 0x10c   : > { %v570_v33 = vmax.f32 %v568_v10, %v569_v62  ;;  %v519_v49 = vmax.f32 %v517_v17, %v518_v48  ;;  %v575_v21 = vmax.f32 %v573_v20, %v574_v27  ;;  %v2716_v22 = vadd.f32 %v705_v0, %v704_v46 }
 0x10d   : > { %v634_v59 = vmul.f32 1.442695, %v590_v4  ;;  %v636_v31 = vmul.f32 1.442695, %v591_v61  ;;  %v736_v15 = vadd.f32 %v735_v1, %v2629_v54  ;;  %v2721_v16 = vadd.f32 %v761_v26, %v760_v52 }
 0x10e   : > { %v606_v37 = vsub.f32 %v2669_v30, %v570_v33  ;;  %v607_v25 = vsub.f32 %v2655_v8, %v570_v33  ;;  %v520_v39 = vrot.slane %v519_v49, 1  ;;  %v576_v42 = vrot.slane %v575_v21, 1 }
 0x10f   : > { %2062 = vpow2.f32 %v634_v59  ;;  %v743_v63 = vadd.f32 %v742_v19, %v2614_v23  ;;  %v3258_v2 = vrot.slane %v2633_v55, 2  ;;  %v754_v46 = vrot.slane %v753_v32, 2 }
 0x110   : > { %v2727_v45 = vpop.eup %2054  ;;  %2064 = vpow2.f32 %v636_v31  ;;  %v666_v43 = vmul.f32 1.442695, %v606_v37  ;;  %v668_v54 = vmul.f32 1.442695, %v607_v25  ;;  %v521_v1 = vmax.f32 %v519_v49, %v520_v39 }
 0x111   : > { %v748_v0 = vadd.f32 %v3258_v2, %v2633_v55  ;;  %v2729_v30 = vpop.eup %2056  ;;  %v577_v8 = vmax.f32 %v575_v21, %v576_v42  ;;  %2066 = vrcp.f32 %v736_v15  ;;  %v755_v49 = vadd.f32 %v754_v46, %v753_v32 }
 0x112   : > { %v2731_v52 = vpop.eup %2058  ;;  %v709_v23 = vadd.f32 %v2729_v30, %v2727_v45  ;;  %2068 = vpow2.f32 %v666_v43  ;;  %v592_v55 = vsub.f32 %v2683_v56, %v521_v1  ;;  %v593_v12 = vsub.f32 %v2674_v36, %v521_v1 }
 0x113   : > { %v749_v5 = vrot.slane %v748_v0, 1  ;;  %v2737_v10 = vpop.eup %2060  ;;  %2070 = vpow2.f32 %v668_v54  ;;  %v608_v17 = vsub.f32 %v2688_v13, %v577_v8  ;;  %v609_v20 = vsub.f32 %v2680_v47, %v577_v8 }
 0x114   : > { %v710_v48 = vrot.slane %v709_v23, 4  ;;  %v765_v27 = vadd.f32 %v2737_v10, %v2731_v52  ;;  %v638_v26 = vmul.f32 1.442695, %v592_v55  ;;  %v640_v4 = vmul.f32 1.442695, %v593_v12 }
 0x115   : > { %v750_v62 = vadd.f32 %v749_v5, %v748_v0  ;;  %v670_v61 = vmul.f32 1.442695, %v608_v17  ;;  %v672_v33 = vmul.f32 1.442695, %v609_v20  ;;  %2072 = vrcp.f32 %v743_v63 }
 0x116   : > { %v711_v56 = vadd.f32 %v710_v48, %v709_v23  ;;  %v766_v36 = vrot.slane %v765_v27, 4  ;;  %2074 = vpow2.f32 %v638_v26  ;;  %v679_v21 = vrot.slane %v2618_v50, 1 }
 0x117   : > { %2076 = vpow2.f32 %v640_v4  ;;  %v756_v13 = vrot.slane %v755_v49, 1  ;;  %v686_v47 = vrot.slane %v2609_v11, 1  ;;  %v3259_v19 = vrot.slane %v2620_v60, 2 }
 0x118   : > { %v712_v31 = vrot.slane %v711_v56, 2  ;;  %v767_v15 = vadd.f32 %v766_v36, %v765_v27  ;;  %2078 = vpow2.f32 %v670_v61  ;;  %v680_v37 = vadd.f32 %v679_v21, %v2618_v50 }
 0x119   : > { %v692_v59 = vadd.f32 %v3259_v19, %v2620_v60  ;;  %v2749_v32 = vpop.eup %2062  ;;  %2080 = vpow2.f32 %v672_v33  ;;  %v757_v25 = vadd.f32 %v756_v13, %v755_v49  ;;  %v687_v39 = vadd.f32 %v686_v47, %v2609_v11 }
 0x11a   : > { %v2752_v63 = vpop.eup %2064  ;;  %v713_v2 = vadd.f32 %v712_v31, %v711_v56  ;;  %v768_v0 = vrot.slane %v767_v15, 2  ;;  %2082 = vrcp.f32 %v750_v62  ;;  %v698_v43 = vrot.slane %v2710_v29, 2 }
 0x11b   : > { %v693_v42 = vrot.slane %v692_v59, 1  ;;  %v2067_v60 = vpop.eup %2066  ;;  %v716_v54 = vadd.f32 %v2752_v63, %v2749_v32  ;;  %2084 = vrcp.f32 %v757_v25  ;;  %v707_v8 = vrot.slane %v2716_v22, 1 }
 0x11c   : > { %v2757_v1 = vpop.eup %2068  ;;  %v763_v11 = vrot.slane %v2721_v16, 1  ;;  %v769_v5 = vadd.f32 %v768_v0, %v767_v15  ;;  %v714_v23 = vrot.slane %v713_v2, 1  ;;  %v699_v12 = vadd.f32 %v698_v43, %v2710_v29 }
 0x11d   : > { %v694_v50 = vadd.f32 %v693_v42, %v692_v59  ;;  %v2761_v46 = vpop.eup %2070  ;;  %v717_v55 = vrot.slane %v716_v54, 4  ;;  %2086 = vrcp.f32 %v680_v37  ;;  %v818_v62 = vmul.f32 %v2067_v60, %v2586_v28 }
 0x11e   : > { %v770_v17 = vrot.slane %v769_v5, 1  ;;  %v772_v20 = vadd.f32 %v2761_v46, %v2757_v1  ;;  %2088 = vrcp.f32 %v687_v39  ;;  %v819_v26 = vmul.f32 %v2067_v60, %v2590_v34 }
 0x11f   : > { %v2073_v48 = vpop.eup %2072  ;;  %v718_v27 = vadd.f32 %v717_v55, %v716_v54  ;;  %v700_v4 = vrot.slane %v699_v12, 1  ;;  %2090 = vrcp.f32 %v694_v50  ;;  %v708_v28 = vadd.f32 %v707_v8, %v2716_v22 }
 0x120   : > { %v2768_v61 = vpop.eup %2074  ;;  %v773_v33 = vrot.slane %v772_v20, 4  ;;  %v820_v49 = vmul.f32 %v2073_v48, %v2560_v9  ;;  %v821_v29 = vmul.f32 %v2073_v48, %v2566_v18  ;;  %v771_v56 = vadd.f32 %v770_v17, %v769_v5 }
 0x121   : > { %v2772_v36 = vpop.eup %2076  ;;  %v719_v21 = vrot.slane %v718_v27, 2  ;;  %v701_v13 = vadd.f32 %v700_v4, %v699_v12  ;;  %v764_v59 = vadd.f32 %v763_v11, %v2721_v16  ;;  %v715_v31 = vadd.f32 %v714_v23, %v713_v2 }
 0x122   : > { %v2775_v47 = vpop.eup %2078  ;;  %v774_v19 = vadd.f32 %v773_v33, %v772_v20  ;;  %v723_v34 = vadd.f32 %v2772_v36, %v2768_v61  ;;  %v846_v18 = vadd.f32 %v820_v49, %v818_v62  ;;  %v849_v37 = vadd.f32 %v821_v29, %v819_v26 }
 0x123   : > { %v2780_v15 = vpop.eup %2080  ;;  %v720_v9 = vadd.f32 %v719_v21, %v718_v27  ;;  %2092 = vrcp.f32 %v701_v13 }
 0x124   : > { %v2083_v25 = vpop.eup %2082  ;;  %v775_v39 = vrot.slane %v774_v19, 2  ;;  %v724_v42 = vrot.slane %v723_v34, 4  ;;  %v779_v22 = vadd.f32 %v2780_v15, %v2775_v47  ;;  %2094 = vrcp.f32 %v771_v56 }
 0x125   : > { %v2085_v0 = vpop.eup %2084  ;;  %v822_v43 = vmul.f32 %v2083_v25, %v2598_v51  ;;  %v823_v60 = vmul.f32 %v2083_v25, %v2600_v14  ;;  %v721_v16 = vrot.slane %v720_v9, 1  ;;  %2096 = vrcp.f32 %v708_v28 }
 0x126   : > { %v776_v2 = vadd.f32 %v775_v39, %v774_v19  ;;  %v725_v54 = vadd.f32 %v724_v42, %v723_v34  ;;  %v780_v50 = vrot.slane %v779_v22, 4  ;;  %v824_v8 = vmul.f32 %v2085_v0, %v2645_v58 }
 0x127   : > { %v2087_v11 = vpop.eup %2086  ;;  %v825_v5 = vmul.f32 %v2085_v0, %v2652_v6  ;;  %v847_v23 = vadd.f32 %v846_v18, %v822_v43  ;;  %v850_v55 = vadd.f32 %v849_v37, %v823_v60  ;;  %v722_v12 = vadd.f32 %v721_v16, %v720_v9  ;;  %v3260_v16 = vld [vmem:[#allocation9_spill] sm:$0xff] }
 0x128   : > { %v2089_v17 = vpop.eup %2088  ;;  %v726_v20 = vrot.slane %v725_v54, 2  ;;  %v781_v62 = vadd.f32 %v780_v50, %v779_v22  ;;  %v802_v51 = vmul.f32 %v2087_v11, %v2577_v24  ;;  %v803_v14 = vmul.f32 %v2087_v11, %v2583_v53 }
 0x129   : > { %v2091_v48 = vpop.eup %2090  ;;  %v848_v27 = vadd.f32 %v847_v23, %v824_v8  ;;  %v851_v26 = vadd.f32 %v850_v55, %v825_v5  ;;  %v804_v4 = vmul.f32 %v2089_v17, %v2551_v3  ;;  %v805_v58 = vmul.f32 %v2089_v17, %v2558_v7  ;;  %v3261_v5 = vld [vmem:[#allocation10_spill] sm:$0xff] }
 0x12a   : > { %v782_v33 = vrot.slane %v781_v62, 2  ;;  %v806_v6 = vmul.f32 %v2091_v48, %v2592_v38  ;;  %v807_v49 = vmul.f32 %v2091_v48, %v2596_v44  ;;  %v777_v29 = vrot.slane %v776_v2, 1 }
 0x12b   : > { %v1869_v56 = vpack.c.bf16 %v851_v26, %v848_v27  ;;  %v834_v21 = vadd.f32 %v804_v4, %v802_v51  ;;  %v837_v13 = vadd.f32 %v805_v58, %v803_v14  ;;  %v727_v28 = vadd.f32 %v726_v20, %v725_v54 }
 0x12c   : > { %v778_v24 = vadd.f32 %v777_v29, %v776_v2  ;;  %v783_v19 = vadd.f32 %v782_v33, %v781_v62  ;;  %2098 = vrcp.f32 %v764_v59  ;;  %v860_v29 = vld [vmem:[%s3241_s3 + $0x10] sm:$0xff] }
 0x12d   : > { %v2093_v53 = vpop.eup %2092  ;;  %1870 = vmatprep.subr.bf16.mxu0 %v1869_v56  ;;  %1951 = vmatprep.subr.bf16.mxu1 %v1869_v56  ;;  %v835_v34 = vadd.f32 %v834_v21, %v806_v6  ;;  %v838_v3 = vadd.f32 %v837_v13, %v807_v49  ;;  %v728_v9 = vrot.slane %v727_v28, 1  ;;  %2100 = vrcp.f32 %v715_v31  ;;  %v882_v49 = vld [vmem:[%s3241_s3 + $0xc0] sm:$0xff]  ;;  %v883_v56 = vld [vmem:[%s3241_s3 + $0xc8] sm:$0xff]  ;;  %v861_v21 = vld [vmem:[%s3241_s3 + $0x18] sm:$0xff] }
 0x12e   : > { %v2095_v7 = vpop.eup %2094  ;;  %v808_v38 = vmul.f32 %v2093_v53, %v2627_v41  ;;  %v809_v44 = vmul.f32 %v2093_v53, %v2637_v40  ;;  %v784_v18 = vrot.slane %v783_v19, 1  ;;  %2102 = vrcp.f32 %v778_v24  ;;  %v884_v13 = vld [vmem:[%s3241_s3 + $0xd0] sm:$0xff]  ;;  %v885_v24 = vld [vmem:[%s3241_s3 + $0xd8] sm:$0xff]  ;;  %v886_v53 = vld [vmem:[%s3241_s3 + $0xe0] sm:$0xff] }
 0x12f   : > { %v2097_v37 = vpop.eup %2096  ;;  %v729_v25 = vadd.f32 %v728_v9, %v727_v28  ;;  %2104 = vrcp.f32 %v722_v12  ;;  %v828_v43 = vmul.f32 %v2095_v7, %v2731_v52  ;;  %v829_v41 = vmul.f32 %v2095_v7, %v2737_v10  ;;  %v862_v28 = vld [vmem:[%s3241_s3 + $0x20] sm:$0xff]  ;;  %v865_v9 = vld [vmem:[%s3241_s3 + $0x38] sm:$0xff]  ;;  %v888_v7 = vld [vmem:[%s3241_s3 + $0xf0] sm:$0xff] }
 0x130   : > { %v836_v39 = vadd.f32 %v835_v34, %v808_v38  ;;  %v839_v42 = vadd.f32 %v838_v3, %v809_v44  ;;  %v785_v59 = vadd.f32 %v784_v18, %v783_v19  ;;  %v810_v60 = vmul.f32 %v2097_v37, %v2685_v57  ;;  %v863_v19 = vld [vmem:[%s3241_s3 + $0x28] sm:$0xff]  ;;  %v864_v34 = vld [vmem:[%s3241_s3 + $0x30] sm:$0xff]  ;;  %v866_v38 = vld [vmem:[%s3241_s3 + $0x40] sm:$0xff] }
 0x131   : > { %2106 = vrcp.f32 %v729_v25  ;;  %v811_v2 = vmul.f32 %v2097_v37, %v3260_v16  ;;  %v887_v3 = vld [vmem:[%s3241_s3 + $0xe8] sm:$0xff]  ;;  %v889_v44 = vld [vmem:[%s3241_s3 + $0xf8] sm:$0xff]  ;;  %v868_v37 = vld [vmem:[%s3241_s3 + $0x50] sm:$0xff] }
 0x132   : > { %v1871_v22 = vpack.c.bf16 %v839_v42, %v836_v39  ;;  %2108 = vrcp.f32 %v785_v59  ;;  %v867_v18 = vld [vmem:[%s3241_s3 + $0x48] sm:$0xff]  ;;  %v869_v25 = vld [vmem:[%s3241_s3 + $0x58] sm:$0xff]  ;;  %v870_v39 = vld [vmem:[%s3241_s3 + $0x60] sm:$0xff] }
 0x133   : > { %v871_v42 = vld [vmem:[%s3241_s3 + $0x68] sm:$0xff]  ;;  %v872_v59 = vld [vmem:[%s3241_s3 + $0x70] sm:$0xff] }
 0x134   : > { %1872 = vmatpush1.bf16.msra.mxu0 %v1871_v22  ;;  %1953 = vmatpush1.bf16.msra.mxu1 %v1871_v22  ;;  %v873_v22 = vld [vmem:[%s3241_s3 + $0x78] sm:$0xff]  ;;  %v880_v16 = vld [vmem:[%s3241_s3 + $0xb0] sm:$0xff] }
 0x136   : > { %v2099_v0 = vpop.eup %2098 }
 0x137   : > { %v2101_v31 = vpop.eup %2100  ;;  %v826_v11 = vmul.f32 %v2099_v0, %v2697_v35  ;;  %v827_v23 = vmul.f32 %v2099_v0, %v3261_v5  ;;  %v874_v0 = vld [vmem:[%s3241_s3 + $0x80] sm:$0xff] }
 0x138   : > { %v2103_v40 = vpop.eup %2102  ;;  %v812_v54 = vmul.f32 %v2101_v31, %v2727_v45  ;;  %v813_v50 = vmul.f32 %v2101_v31, %v2729_v30  ;;  %v875_v31 = vld [vmem:[%s3241_s3 + $0x88] sm:$0xff] }
 0x139   : > { %v2105_v8 = vpop.eup %2104  ;;  %v830_v55 = vmul.f32 %v2103_v40, %v2757_v1  ;;  %v831_v52 = vmul.f32 %v2103_v40, %v2761_v46  ;;  %v852_v62 = vadd.f32 %v828_v43, %v826_v11  ;;  %v855_v45 = vadd.f32 %v829_v41, %v827_v23  ;;  %v876_v43 = vld [vmem:[%s3241_s3 + $0x90] sm:$0xff]  ;;  %v877_v41 = vld [vmem:[%s3241_s3 + $0x98] sm:$0xff]  ;;  %v878_v40 = vld [vmem:[%s3241_s3 + $0xa0] sm:$0xff] }
 0x13a   : > { %v814_v10 = vmul.f32 %v2105_v8, %v2749_v32  ;;  %v815_v12 = vmul.f32 %v2105_v8, %v2752_v63  ;;  %v840_v57 = vadd.f32 %v812_v54, %v810_v60  ;;  %v843_v17 = vadd.f32 %v813_v50, %v811_v2  ;;  %v879_v60 = vld [vmem:[%s3241_s3 + $0xa8] sm:$0xff]  ;;  %v1247_v2 = vld [vmem:[%s3242_s4 + $0x18] sm:$0xff] }
 0x13b   : > { %v2107_v20 = vpop.eup %2106  ;;  %v853_v27 = vadd.f32 %v852_v62, %v830_v55  ;;  %v856_v32 = vadd.f32 %v855_v45, %v831_v52 }
 0x13c   : > { %v2109_v51 = vpop.eup %2108  ;;  %v816_v30 = vmul.f32 %v2107_v20, %v2768_v61  ;;  %v817_v35 = vmul.f32 %v2107_v20, %v2772_v36  ;;  %v841_v14 = vadd.f32 %v840_v57, %v814_v10  ;;  %v844_v48 = vadd.f32 %v843_v17, %v815_v12  ;;  %v858_v61 = vld [vmem:[%s3241_s3] sm:$0xff]  ;;  %v881_v36 = vld [vmem:[%s3241_s3 + $0xb8] sm:$0xff] }
 0x13d   : > { %v832_v1 = vmul.f32 %v2109_v51, %v2775_v47  ;;  %v833_v46 = vmul.f32 %v2109_v51, %v2780_v15  ;;  %v3262_v47 = vmov 0.0   ;;  %v859_v15 = vld [vmem:[%s3241_s3 + $0x8] sm:$0xff] }
 0x13e   : > { %v842_v26 = vadd.f32 %v841_v14, %v816_v30  ;;  %v845_v63 = vadd.f32 %v844_v48, %v817_v35 }
 0x13f   : > { %v854_v4 = vadd.f32 %v853_v27, %v832_v1  ;;  %v857_v58 = vadd.f32 %v856_v32, %v833_v46 }
 0x140   : > { %v1875_v33 = vpack.c.bf16 %v845_v63, %v842_v26 }
 0x141   : > { %v1873_v6 = vpack.c.bf16 %v857_v58, %v854_v4 }
 0x143   : > { %1874 = vmatprep.subr.bf16.mxu0 %v1873_v6  ;;  %1952 = vmatprep.subr.bf16.mxu1 %v1873_v6 }
 0x144   : > { %1876 = vmatpush1.bf16.msra.mxu0 %v1875_v33  ;;  %1954 = vmatpush1.bf16.msra.mxu1 %v1875_v33 }
 0x147   : > { %1721 = vmatmul.mubr.msk.f32.vlgmr.msra.gmra.mrb[0].mxu0 %vm890_vm0, %v858_v61  ;;  %1744 = vmatmul.mubr.msk.f32.vlgmr.msra.gmra.mrb[0].mxu1 %vm890_vm0, %v881_v36 }
 0x148   : > { %1057 = vmatprep.mubr.f32.mxu0 %v3262_v47  ;;  %1195 = vmatprep.mubr.f32.mxu1 %v3262_v47 }
 0x14b   : > { %1722 = vmatmul.mubr.msk.f32.gmra.mrb[2].mxu0 %vm890_vm0, %v859_v15  ;;  %1745 = vmatmul.mubr.msk.f32.gmra.mrb[2].mxu1 %vm890_vm0, %v882_v49 }
 0x14c   : > { %1063 = vmatprep.mubr.f32.mxu0 %v3262_v47  ;;  %1201 = vmatprep.mubr.f32.mxu1 %v3262_v47 }
 0x14f   : > { %1723 = vmatmul.mubr.msk.f32.gmra.mrb[4].mxu0 %vm890_vm0, %v860_v29  ;;  %1746 = vmatmul.mubr.msk.f32.gmra.mrb[4].mxu1 %vm890_vm0, %v883_v56 }
 0x150   : > { %1069 = vmatprep.mubr.f32.mxu0 %v3262_v47  ;;  %1207 = vmatprep.mubr.f32.mxu1 %v3262_v47 }
 0x153   : > { %1724 = vmatmul.mubr.msk.f32.gmra.mrb[6].mxu0 %vm890_vm0, %v861_v21  ;;  %1747 = vmatmul.mubr.msk.f32.gmra.mrb[6].mxu1 %vm890_vm0, %v884_v13 }
 0x154   : > { %1075 = vmatprep.mubr.f32.mxu0 %v3262_v47  ;;  %1213 = vmatprep.mubr.f32.mxu1 %v3262_v47 }
 0x157   : > { %1725 = vmatmul.mubr.msk.f32.gmra.mrb[8].mxu0 %vm890_vm0, %v862_v28  ;;  %1748 = vmatmul.mubr.msk.f32.gmra.mrb[8].mxu1 %vm890_vm0, %v885_v24 }
 0x158   : > { %1081 = vmatprep.mubr.f32.mxu0 %v3262_v47  ;;  %1219 = vmatprep.mubr.f32.mxu1 %v3262_v47 }
 0x15b   : > { %1726 = vmatmul.mubr.msk.f32.gmra.mrb[10].mxu0 %vm890_vm0, %v863_v19  ;;  %1749 = vmatmul.mubr.msk.f32.gmra.mrb[10].mxu1 %vm890_vm0, %v886_v53 }
 0x15c   : > { %1087 = vmatprep.mubr.f32.mxu0 %v3262_v47  ;;  %1225 = vmatprep.mubr.f32.mxu1 %v3262_v47 }
 0x15f   : > { %1727 = vmatmul.mubr.msk.f32.gmra.mrb[12].mxu0 %vm890_vm0, %v864_v34  ;;  %1750 = vmatmul.mubr.msk.f32.gmra.mrb[12].mxu1 %vm890_vm0, %v887_v3 }
 0x160   : > { %1093 = vmatprep.mubr.f32.mxu0 %v3262_v47  ;;  %1231 = vmatprep.mubr.f32.mxu1 %v3262_v47 }
 0x163   : > { %1728 = vmatmul.mubr.msk.f32.gmra.mrb[14].mxu0 %vm890_vm0, %v865_v9  ;;  %1751 = vmatmul.mubr.msk.f32.gmra.mrb[14].mxu1 %vm890_vm0, %v888_v7 }
 0x164   : > { %1099 = vmatprep.mubr.f32.mxu0 %v3262_v47  ;;  %1237 = vmatprep.mubr.f32.mxu1 %v3262_v47 }
 0x167   : > { %1729 = vmatmul.mubr.msk.f32.gmra.mrb[16].mxu0 %vm890_vm0, %v866_v38  ;;  %1752 = vmatmul.mubr.msk.f32.gmra.mrb[16].mxu1 %vm890_vm0, %v889_v44 }
 0x168   : > { %1105 = vmatprep.mubr.f32.mxu0 %v3262_v47  ;;  %1316 = vmatprep.mubr.f32.mxu1 %v1247_v2 }
 0x16b   : > { %1730 = vmatmul.mubr.msk.f32.gmra.mrb[18].mxu0 %vm890_vm0, %v867_v18 }
 0x16c   : > { %1111 = vmatprep.mubr.f32.mxu0 %v3262_v47 }
 0x16f   : > { %1731 = vmatmul.mubr.msk.f32.gmra.mrb[20].mxu0 %vm890_vm0, %v868_v37 }
 0x170   : > { %1117 = vmatprep.mubr.f32.mxu0 %v3262_v47 }
 0x173   : > { %1732 = vmatmul.mubr.msk.f32.gmra.mrb[22].mxu0 %vm890_vm0, %v869_v25 }
 0x174   : > { %1123 = vmatprep.mubr.f32.mxu0 %v3262_v47 }
 0x177   : > { %1733 = vmatmul.mubr.msk.f32.gmra.mrb[24].mxu0 %vm890_vm0, %v870_v39 }
 0x178   : > { %1129 = vmatprep.mubr.f32.mxu0 %v3262_v47 }
 0x17b   : > { %1734 = vmatmul.mubr.msk.f32.gmra.mrb[26].mxu0 %vm890_vm0, %v871_v42 }
 0x17c   : > { %1135 = vmatprep.mubr.f32.mxu0 %v3262_v47 }
 0x17f   : > { %1735 = vmatmul.mubr.msk.f32.gmra.mrb[28].mxu0 %vm890_vm0, %v872_v59 }
 0x180   : > { %1141 = vmatprep.mubr.f32.mxu0 %v3262_v47 }
 0x183   : > { %1736 = vmatmul.mubr.msk.f32.gmra.mrb[30].mxu0 %vm890_vm0, %v873_v22 }
 0x184   : > { %1147 = vmatprep.mubr.f32.mxu0 %v3262_v47 }
 0x187   : > { %1737 = vmatmul.mubr.msk.f32.gmra.mrb[32].mxu0 %vm890_vm0, %v874_v0 }
 0x188   : > { %1153 = vmatprep.mubr.f32.mxu0 %v3262_v47 }
 0x18b   : > { %1738 = vmatmul.mubr.msk.f32.gmra.mrb[34].mxu0 %vm890_vm0, %v875_v31 }
 0x18c   : > { %1159 = vmatprep.mubr.f32.mxu0 %v3262_v47 }
 0x18f   : > { %1739 = vmatmul.mubr.msk.f32.gmra.mrb[36].mxu0 %vm890_vm0, %v876_v43 }
 0x190   : > { %1165 = vmatprep.mubr.f32.mxu0 %v3262_v47 }
 0x193   : > { %1740 = vmatmul.mubr.msk.f32.gmra.mrb[38].mxu0 %vm890_vm0, %v877_v41 }
 0x194   : > { %1171 = vmatprep.mubr.f32.mxu0 %v3262_v47 }
 0x197   : > { %1741 = vmatmul.mubr.msk.f32.gmra.mrb[40].mxu0 %vm890_vm0, %v878_v40 }
 0x198   : > { %1177 = vmatprep.mubr.f32.mxu0 %v3262_v47 }
 0x19b   : > { %1742 = vmatmul.mubr.msk.f32.gmra.mrb[42].mxu0 %vm890_vm0, %v879_v60 }
 0x19c   : > { %1183 = vmatprep.mubr.f32.mxu0 %v3262_v47 }
 0x19f   : > { %1743 = vmatmul.mubr.msk.f32.gmra.mrb[44].mxu0 %vm890_vm0, %v880_v16 }
 0x21a   : > { %v2973_v54 = vpop.f32.mrb[0].mxu0  ;;  %v2975_v50 = vpop.f32.mrb[0].mxu1 }
 0x21b   : > { %v2977_v8 = vpop.f32.mrb[1].mxu0  ;;  %v2979_v11 = vpop.f32.mrb[1].mxu1 }
 0x21e   : > { %v2981_v5 = vpop.f32.mrb[2].mxu0  ;;  %v2983_v23 = vpop.f32.mrb[2].mxu1 }
 0x21f   : > { %v2987_v52 = vpop.f32.mrb[3].mxu0  ;;  %v2989_v10 = vpop.f32.mrb[3].mxu1 }
 0x220   : > { %v1879_v12 = vpack.c.bf16 %v2987_v52, %v2977_v8 }
 0x222   : > { %v2993_v57 = vpop.f32.mrb[4].mxu0  ;;  %v2995_v17 = vpop.f32.mrb[4].mxu1 }
 0x223   : > { %v2997_v20 = vpop.f32.mrb[5].mxu0  ;;  %v3001_v45 = vpop.f32.mrb[5].mxu1 }
 0x224   : > { %v1893_v51 = vpack.c.bf16 %v3001_v45, %v2989_v10  ;;  %v1251_v10 = vld [vmem:[%s3242_s4 + $0x38] sm:$0xff]  ;;  %v1250_v45 = vld [vmem:[%s3242_s4 + $0x30] sm:$0xff] }
 0x226   : > { %v3005_v30 = vpop.f32.mrb[6].mxu0  ;;  %v3007_v35 = vpop.f32.mrb[6].mxu1 }
 0x227   : > { %v3011_v48 = vpop.f32.mrb[7].mxu0  ;;  %v3013_v1 = vpop.f32.mrb[7].mxu1 }
 0x228   : > { %v1883_v46 = vpack.c.bf16 %v3011_v48, %v2997_v20  ;;  %v3265_v20 = vpack.c.bf16 %v2981_v5, %v2973_v54  ;;  %v3266_v48 = vpack.c.bf16 %v3005_v30, %v2993_v57 }
 0x22a   : > { %v3017_v27 = vpop.f32.mrb[8].mxu0  ;;  %v3019_v32 = vpop.f32.mrb[8].mxu1 }
 0x22b   : > { %v3021_v26 = vpop.f32.mrb[9].mxu0  ;;  %v3025_v4 = vpop.f32.mrb[9].mxu1  ;;  %v3271_v57 = vpack.c.bf16 %v3019_v32, %v3007_v35  ;;  %v1244_v32 = vld [vmem:[%s3242_s4] sm:$0xff] }
 0x22e   : > { %v3029_v33 = vpop.f32.mrb[10].mxu0  ;;  %v3031_v6 = vpop.f32.mrb[10].mxu1 }
 0x22f   : > { %v3035_v36 = vpop.f32.mrb[11].mxu0  ;;  %v3037_v15 = vpop.f32.mrb[11].mxu1  ;;  %v3267_v54 = vpack.c.bf16 %v3029_v33, %v3017_v27 }
 0x230   : > { %v1887_v49 = vpack.c.bf16 %v3035_v36, %v3021_v26  ;;  %v1249_v26 = vld [vmem:[%s3242_s4 + $0x28] sm:$0xff] }
 0x232   : > { %v3041_v29 = vpop.f32.mrb[12].mxu0  ;;  %v3043_v56 = vpop.f32.mrb[12].mxu1 }
 0x233   : > { %v3045_v21 = vpop.f32.mrb[13].mxu0  ;;  %v3049_v28 = vpop.f32.mrb[13].mxu1  ;;  %v3273_v27 = vpack.c.bf16 %v3043_v56, %v3031_v6 }
 0x236   : > { %v3053_v19 = vpop.f32.mrb[14].mxu0  ;;  %v3055_v53 = vpop.f32.mrb[14].mxu1 }
 0x237   : > { %v1097_v3 = vpop.f32.mrb[15].mxu0  ;;  %v3059_v9 = vpop.f32.mrb[15].mxu1  ;;  %v3268_v5 = vpack.c.bf16 %v3053_v19, %v3041_v29 }
 0x238   : > { %v1891_v7 = vpack.c.bf16 %v1097_v3, %v3045_v21 }
 0x23a   : > { %v3062_v38 = vpop.f32.mrb[16].mxu0  ;;  %v3064_v44 = vpop.f32.mrb[16].mxu1 }
 0x23b   : > { %v1103_v18 = vpop.f32.mrb[17].mxu0  ;;  %v1241_v25 = vpop.f32.mrb[17].mxu1 }
 0x23c   : > { %v1905_v39 = vpack.c.bf16 %v1241_v25, %v3059_v9 }
 0x23e   : > { %v3069_v42 = vpop.f32.mrb[18].mxu0 }
 0x23f   : > { %v1109_v22 = vpop.f32.mrb[19].mxu0 }
 0x240   : > { %v1895_v0 = vpack.c.bf16 %v1109_v22, %v1103_v18 }
 0x242   : > { %v3073_v31 = vpop.f32.mrb[20].mxu0 }
 0x243   : > { %v1115_v43 = vpop.f32.mrb[21].mxu0 }
 0x246   : > { %v3075_v41 = vpop.f32.mrb[22].mxu0 }
 0x247   : > { %v1121_v60 = vpop.f32.mrb[23].mxu0  ;;  %v3272_v30 = vpack.c.bf16 %v3075_v41, %v3073_v31 }
 0x248   : > { %v1899_v16 = vpack.c.bf16 %v1121_v60, %v1115_v43 }
 0x24a   : > { %v3079_v2 = vpop.f32.mrb[24].mxu0 }
 0x24b   : > { %v1127_v21 = vpop.f32.mrb[25].mxu0 }
 0x24e   : > { %v3081_v3 = vpop.f32.mrb[26].mxu0 }
 0x24f   : > { %v1133_v25 = vpop.f32.mrb[27].mxu0 }
 0x250   : > { %v1903_v18 = vpack.c.bf16 %v1133_v25, %v1127_v21 }
 0x252   : > { %v3085_v22 = vpop.f32.mrb[28].mxu0 }
 0x253   : > { %v1139_v37 = vpop.f32.mrb[29].mxu0 }
 0x256   : > { %v3087_v13 = vpop.f32.mrb[30].mxu0 }
 0x257   : > { %v1145_v63 = vpop.f32.mrb[31].mxu0  ;;  %v3276_v35 = vpack.c.bf16 %v3087_v13, %v3085_v22 }
 0x258   : > { %v1907_v43 = vpack.c.bf16 %v1145_v63, %v1139_v37 }
 0x25a   : > { %v1149_v60 = vpop.f32.mrb[32].mxu0 }
 0x25b   : > { %v1151_v59 = vpop.f32.mrb[33].mxu0 }
 0x25e   : > { %v1155_v62 = vpop.f32.mrb[34].mxu0 }
 0x25f   : > { %v1909_v34 = vpack.c.bf16 %v1155_v62, %v1149_v60  ;;  %v1157_v61 = vpop.f32.mrb[35].mxu0 }
 0x260   : > { %v1877_v14 = vpack.c.bf16 %v1157_v61, %v1151_v59 }
 0x262   : > { %v1161_v55 = vpop.f32.mrb[36].mxu0  ;;  %1878 = vmatprep.subr.bf16.mxu1 %v1877_v14 }
 0x263   : > { %v1163_v9 = vpop.f32.mrb[37].mxu0  ;;  %1880 = vmatpush3.bf16.msra.mxu1 %v1879_v12  ;;  %v3263_v12 = vpack.c.bf16 %v3025_v4, %v3013_v1  ;;  %v3269_v1 = vpack.c.bf16 %v2995_v17, %v2983_v23  ;;  %v3274_v23 = vpack.c.bf16 %v3081_v3, %v3079_v2  ;;  %v3275_v17 = vpack.c.bf16 %v3064_v44, %v3055_v53  ;;  %v1248_v4 = vld [vmem:[%s3242_s4 + $0x20] sm:$0xff]  ;;  %v1407_v53 = vpop.permute.xlu0 %1406  ;;  %v1421_v2 = vld [vmem:[%s3243_s5 + $0x8] sm:$0xff]  ;;  %v1422_v3 = vld [vmem:[%s3243_s5 + $0x10] sm:$0xff] }
 0x266   : > { %v1167_v21 = vpop.f32.mrb[38].mxu0 }
 0x267   : > { %v1913_v25 = vpack.c.bf16 %v1167_v21, %v1161_v55  ;;  %v1169_v24 = vpop.f32.mrb[39].mxu0 }
 0x268   : > { %v1881_v58 = vpack.c.bf16 %v1169_v24, %v1163_v9  ;;  %v1423_v9 = vld [vmem:[%s3243_s5 + $0x18] sm:$0xff] }
 0x26a   : > { %v1173_v40 = vpop.f32.mrb[40].mxu0  ;;  %1882 = vmatprep.subr.bf16.mxu1 %v1881_v58  ;;  %v1420_v58 = vld [vmem:[%s3243_s5] sm:$0xff] }
 0x26b   : > { %v1175_v63 = vpop.f32.mrb[41].mxu0  ;;  %1884 = vmatpush3.bf16.msra.mxu1 %v1883_v46  ;;  %v3270_v46 = vpack.c.bf16 %v3069_v42, %v3062_v38 }
 0x26e   : > { %v1179_v62 = vpop.f32.mrb[42].mxu0 }
 0x26f   : > { %v1917_v61 = vpack.c.bf16 %v1179_v62, %v1173_v40  ;;  %v1181_v37 = vpop.f32.mrb[43].mxu0 }
 0x270   : > { %v1885_v14 = vpack.c.bf16 %v1181_v37, %v1175_v63 }
 0x272   : > { %v1185_v59 = vpop.f32.mrb[44].mxu0  ;;  %1886 = vmatprep.subr.bf16.mxu1 %v1885_v14 }
 0x273   : > { %v1921_v8 = vpack.c.bf16 %v2975_v50, %v1185_v59  ;;  %v1187_v52 = vpop.f32.mrb[45].mxu0  ;;  %1888 = vmatpush3.bf16.msra.mxu1 %v1887_v49  ;;  %v3264_v50 = vpack.c.bf16 %v3049_v28, %v3037_v15 }
 0x274   : > { %v1889_v55 = vpack.c.bf16 %v2979_v11, %v1187_v52  ;;  %v1246_v11 = vld [vmem:[%s3242_s4 + $0x10] sm:$0xff] }
 0x276   : > { %1890 = vmatprep.subr.bf16.mxu1 %v1889_v55 }
 0x277   : > { %1892 = vmatpush3.bf16.msra.mxu1 %v1891_v7 }
 0x278   : > { %1894 = vmatprep.subr.bf16.mxu1 %v1893_v51  ;;  %v1245_v51 = vld [vmem:[%s3242_s4 + $0x8] sm:$0xff] }
 0x27b   : > { %1896 = vmatpush3.bf16.msra.mxu1 %v1895_v0 }
 0x27c   : > { %1898 = vmatprep.subr.bf16.mxu1 %v3263_v12 }
 0x27f   : > { %1900 = vmatpush3.bf16.msra.mxu1 %v1899_v16 }
 0x280   : > { %1902 = vmatprep.subr.bf16.mxu1 %v3264_v50 }
 0x283   : > { %1904 = vmatpush3.bf16.msra.mxu1 %v1903_v18  ;;  %v2214_v18 = vmov 0.0|0.0  }
 0x284   : > { %1906 = vmatprep.subr.bf16.mxu1 %v1905_v39  ;;  %v1412_v39 = vpop.permute.xlu1 %1411 }
 0x287   : > { %1908 = vmatpush3.bf16.msra.mxu1 %v1907_v43  ;;  %v1431_v43 = vpop.permute.xlu0 %1430 }
 0x288   : > { %1910 = vmatprep.subr.bf16.mxu1 %v1909_v34  ;;  %v1436_v22 = vpop.permute.xlu1 %1435 }
 0x28a   : > { %1317 = vmatmul.mubr.f32.vlgmr.msra.gmra.mrb[18].mxu1 %v1246_v11 }
 0x28b   : > { %1912 = vmatpush3.bf16.msra.mxu1 %v3265_v20  ;;  %1321 = vmatprep.mubr.f32.mxu1 %v1251_v10  ;;  %v1441_v59 = vpop.permute.xlu0 %1440 }
 0x28c   : > { %1914 = vmatprep.subr.bf16.mxu1 %v1913_v25 }
 0x28e   : > { %1322 = vmatmul.mubr.f32.gmra.mrb[20].mxu1 %v1250_v45 }
 0x28f   : > { %1916 = vmatpush3.bf16.msra.mxu1 %v3266_v48  ;;  %1391 = vmatprep.mubr.f32.mxu1 %v1245_v51  ;;  %v1554_v48 = vld [vmem:[%s3243_s5 + $0x50] sm:$0x1] }
 0x290   : > { %1918 = vmatprep.subr.bf16.mxu1 %v1917_v61  ;;  %v1446_v61 = vpop.permute.xlu1 %1445 }
 0x293   : > { %1920 = vmatpush3.bf16.msra.mxu1 %v3267_v54  ;;  %v1559_v54 = vpop.permute.xlu0 %1558 }
 0x294   : > { %1922 = vmatprep.subr.bf16.mxu1 %v1921_v8 }
 0x297   : > { %1924 = vmatpush3.bf16.msra.mxu1 %v3268_v5 }
 0x298   : > { %1926 = vmatprep.subr.bf16.mxu1 %v3269_v1 }
 0x29b   : > { %1928 = vmatpush3.bf16.msra.mxu1 %v3270_v46 }
 0x29c   : > { %1930 = vmatprep.subr.bf16.mxu1 %v3271_v57 }
 0x29f   : > { %1932 = vmatpush3.bf16.msra.mxu1 %v3272_v30 }
 0x2a0   : > { %1934 = vmatprep.subr.bf16.mxu1 %v3273_v27 }
 0x2a3   : > { %1936 = vmatpush3.bf16.msra.mxu1 %v3274_v23 }
 0x2a4   : > { %1938 = vmatprep.subr.bf16.mxu1 %v3275_v17 }
 0x2a7   : > { %1940 = vmatpush3.bf16.msra.mxu1 %v3276_v35 }
 0x2aa   : > { %1392 = vmatmul.mubr.f32.vlgmr.msra.gmra.mrb[22].mxu1 %v1244_v32 }
 0x2ab   : > { %1396 = vmatprep.mubr.f32.mxu1 %v1249_v26 }
 0x2ae   : > { %1397 = vmatmul.mubr.f32.gmra.mrb[24].mxu1 %v1248_v4 }
 0x2af   : > { %1852 = vmatprep.mubr.msk.f32.mxu1 %vm1448_vm1, %v1420_v58 }
 0x35d   : > { %v1793_v33 = vpop.f32.mrb[18].mxu1 }
 0x35e   : > { %v1794_v6 = vpop.f32.mrb[19].mxu1 }
 0x35f   : > { %v1795_v36 = vadd.f32 %v1794_v6, %v1793_v33 }
 0x361   : > { %v1796_v15 = vpop.f32.mrb[20].mxu1 }
 0x362   : > { %v1797_v49 = vpop.f32.mrb[21].mxu1 }
 0x363   : > { %v1798_v29 = vadd.f32 %v1797_v49, %v1796_v15 }
 0x37d   : > { %v1831_v56 = vpop.f32.mrb[22].mxu1 }
 0x37e   : > { %v1832_v13 = vpop.f32.mrb[23].mxu1 }
 0x37f   : > { %v1833_v28 = vadd.f32 %v1832_v13, %v1831_v56 }
 0x381   : > { %v1394_v24 = vadd.f32 %v1833_v28, %v1795_v36  ;;  %v1834_v19 = vpop.f32.mrb[24].mxu1 }
 0x382   : > { %v1835_v34 = vpop.f32.mrb[25].mxu1 }
 0x383   : > { %v1414_v7 = vadd.f32 %v1407_v53, %v1394_v24  ;;  %v1836_v38 = vadd.f32 %v1835_v34, %v1834_v19 }
 0x385   : > { %v1399_v44 = vadd.f32 %v1836_v38, %v1798_v29  ;;  %v1416_v42 = vmul.f32 0.01, %v1414_v7 }
 0x387   : > { %v1415_v0 = vadd.f32 %v1412_v39, %v1399_v44  ;;  %v1418_v41 = vmax.f32 %v1414_v7, %v1416_v42 }
 0x389   : > { %v1417_v31 = vmul.f32 0.01, %v1415_v0 }
 0x38b   : > { %v1419_v40 = vmax.f32 %v1415_v0, %v1417_v31 }
 0x38d   : > { %v1941_v16 = vpack.c.bf16 %v1419_v40, %v1418_v41 }
 0x38f   : > { %1942 = vmatprep.subr.bf16.mxu1 %v1941_v16 }
 0x390   : > { %1944 = vmatpush3.bf16.msra.mxu1 %v1941_v16 }
 0x391   : > { %1945 = vmatprep.subr.bf16.mxu1 %v2214_v18 }
 0x393   : > { %1853 = vmatmul.mubr.msk.f32.vlgmr.msra.gmra.mrb[26].mxu1 %vm1448_vm1, %v1421_v2 }
 0x394   : > { %1855 = vmatprep.mubr.msk.f32.mxu1 %vm1448_vm1, %v1422_v3 }
 0x397   : > { %1856 = vmatmul.mubr.msk.f32.gmra.mrb[28].mxu1 %vm1448_vm1, %v1423_v9 }
 0x398   : > { %1866 = vmatprep.mubr.msk.f32.mxu1 %vm2215_vm2, %v3262_v47 }
 0x466   : > { %v1854_v60 = vpop.f32.mrb[26].mxu1 }
 0x467   : > { %v1533_v21 = vadd.f32 %v1854_v60, %v1436_v22  ;;  %v1527_v25 = vpop.f32.mrb[27].mxu1 }
 0x468   : > { %v1528_v63 = vadd.f32 %v1527_v25, %v1431_v43 }
 0x469   : > { %v1547_v62 = vmul.f32 0.01, %v1533_v21 }
 0x46a   : > { %v1546_v37 = vmul.f32 0.01, %v1528_v63  ;;  %v1857_v14 = vpop.f32.mrb[28].mxu1 }
 0x46b   : > { %v1551_v8 = vmax.f32 %v1533_v21, %v1547_v62  ;;  %v1543_v52 = vadd.f32 %v1857_v14, %v1446_v61  ;;  %v1537_v55 = vpop.f32.mrb[29].mxu1 }
 0x46c   : > { %v1550_v12 = vmax.f32 %v1528_v63, %v1546_v37  ;;  %v1538_v50 = vadd.f32 %v1537_v55, %v1441_v59 }
 0x46d   : > { %v1549_v11 = vmul.f32 0.01, %v1543_v52 }
 0x46e   : > { %v1946_v47 = vpack.c.bf16 %v1551_v8, %v1550_v12  ;;  %v1548_v10 = vmul.f32 0.01, %v1538_v50 }
 0x46f   : > { %v1553_v20 = vmax.f32 %v1543_v52, %v1549_v11 }
 0x470   : > { %v1552_v45 = vmax.f32 %v1538_v50, %v1548_v10  ;;  %1947 = vmatpush3.bf16.msra.mxu1 %v1946_v47 }
 0x471   : > { %1948 = vmatprep.subr.bf16.mxu1 %v2214_v18 }
 0x472   : > { %v1949_v51 = vpack.c.bf16 %v1553_v20, %v1552_v45 }
 0x474   : > { %1950 = vmatpush3.bf16.msra.mxu1 %v1949_v51 }
 0x477   : > { %1867 = vmatmul.mubr.msk.f32.vlgmr.msra.gmra.mrb[30].mxu1 %vm890_vm0, %v1554_v48 }
 0x54a   : > { %v1630_v5 = vpop.f32.mrb[30].mxu1 }
 0x54b   : > { %v1631_v1 = vadd.f32 %v1630_v5, %v1559_v54  ;;  %v1868_v46 = vpop.f32.mrb[31].mxu1 }
 0x54d   : > { %1634 = vst [vmem:[%s268_s15] sm:$0x1] %v1631_v1 }
 0x54e   : > { %2153 = shalt.err (!%p2150_p3)
}
 0x54f   : > { %s2154_s29 = scalar_lea.hbm %s3194_s22, 16  ;;  %s2158_s21 = scalar_lea.hbm %s3244_s6, 32 }
 0x550   : > { %p2155_p5 = scmp.ne.s32.totalorder %s3194_s22, %s2154_s29  ;;  %p2159_p9 = scmp.lt.u32.totalorder %s3194_s22, %s3244_s6 }
 0x551   : > { %p2160_p0 = scmp.lt.u32.totalorder %s2158_s21, %s2154_s29  ;;  %p2162_p6 = scmp.lt.u32.totalorder %s2154_s29, %s3194_s22 }
 0x552   : > { %p2156_p7 = pnand %p2155_p5, %p3277_p11 }
 0x553   : > { %p2161_p2 = por %p2160_p0, %p2159_p9 }
 0x554   : > { %p2157_p8 = pneg %p2156_p7 }
 0x555   : > { %p2163_p12 = por %p2162_p6, %p2161_p2 }
 0x557   : > { %p2164_p13 = pnand %p2163_p12, %p2157_p8 }
 0x559   : > { %2167 = shalt.err (!%p2164_p13)
}
 0x55a   : > { %1959 = dma.vmem_to_hbm [thread:$0]  (%p3277_p11), %s3196_s9, 16, %s3194_s22, %s1636_s27  }
 0x55b PF: > { %s1660_s13 = sand.u32 1, %s2194_s23   ;;  %p3278_p4 = scmp.ne.s32.totalorder %s3253_s11, 0 }
 0x55c   : > { %p3279_p10 = scmp.ge.s32.totalorder %s2206_s26, 2  ;;  %s1661_s15 = scalar_lea.sflag [#allocation5], %s1660_s13 }
 0x55e   : > { %p1966_p1 = pnand %p3279_p10, %p3278_p4 }
 0x560   : > { %2189 = dma.done.wait (!%p1966_p1), %s1661_s15, 16  }
 0x561   : > { %2191 = vsyncadd (!%p1966_p1), %s1661_s15, 4294967280  ;;  %p20_p3 = scmp.ge.s32.totalorder %s2280_s28, 4   ;;  %s3280_s23 = smov %s2198_s24 }
 0x562   : > { %s3281_s24 = smov %s2202_s25  ;;  %s3282_s25 = smov %s2292_s7 }
 0x563   : > { %s3283_s26 = smov %s2280_s28  ;;  %22 = sbr.rel (!%p20_p3) target bundleno = 7 (0x7), region = 89 }
 0x56a   :  { %1665 = vsyncpa [#allocation4], 1 }
 0x56b   :  { %1667 = vsyncpa [#allocation4 + $0x1], 1 }
 0x56c   :  { %1668 = vsyncpa [#allocation5], 1 }
 0x56d   :  { %1670 = vsyncpa [#allocation5 + $0x1], 1 }

</bundles_post_ra>
